<compile_context>
chip_gen: v6e
topology: v6e:2x2x1
jax: 0.10.0
libtpu: 0.0.40
codegen_flags: <defaults>
</compile_context>

<pallas_src>
import math
import jax
import jax.numpy as jnp
from jax.experimental import pallas as pl
from jax.experimental.pallas import tpu as pltpu

# ---------------- synthetic small config ----------------
VOCAB = 100
HIDDEN = 32          # stands in for 768
INTERMEDIATE = 64
NUM_LAYERS = 4       # need >= 4 so that "last 4 hidden states" exists
MAX_POS = 16
NUM_LABELS = 19
LN_EPS = 1e-12

LANE = 128                 # TPU lane width
QKV_COLS = 3 * LANE        # q / k / v each get a 128-lane slot (lane-dense matmul out)
CLS_COLS = LANE            # classifier output padded 19 -> 128 (unmasked store)
ATTN_SCALE = 1.0 / math.sqrt(HIDDEN)


def _layernorm(x, g, b):
    mu = jnp.mean(x, axis=-1, keepdims=True)
    var = jnp.mean((x - mu) ** 2, axis=-1, keepdims=True)
    return (x - mu) * jax.lax.rsqrt(var + LN_EPS) * g + b


def _gelu(x):
    # TODO(synk): tanh-approx GELU; HuggingFace BERT default is the erf variant
    # (differences at the ~1e-3 level).
    return 0.5 * x * (1.0 + jnp.tanh(0.7978845608028654 * (x + 0.044715 * x * x * x)))


# ---------------- fused Pallas kernel ----------------
def fused_bert_kernel(h0_ref, mask_ref,
                      wqkv_ref, bqkv_ref, wo_ref, wi_ref, wo2_ref,
                      vecs_ref, bi_ref, clsw_ref, clsb_ref,
                      hs_ref, logits_ref):
    # TODO(synk): single-head attention (synthetic config, num_heads=1); the
    # multi-head split/merge of the hidden dim is omitted.
    # TODO(synk): on v7x, split B across the two TensorCores (core_map /
    # parallel grid axis); at B=2 with a fully fused kernel one block is fine.
    B, S, H = h0_ref.shape
    bf16 = jnp.bfloat16

    h = h0_ref[...]                       # (B, S, H) f32
    hs_ref[0] = h                         # hidden_states[0] = embedding output
    mask_add = mask_ref[...]              # (B, 1, S) additive attention mask

    layer_h = [h]
    for l in range(NUM_LAYERS):           # static unroll: activations stay in vregs/VMEM
        x2 = h.reshape(B * S, H)          # fold batch into sublane dim for matmuls

        # --- fused QKV matmul: one lane-dense (B*S, 384) result -------------
        qkv = jnp.dot(x2.astype(bf16), wqkv_ref[l],
                      preferred_element_type=jnp.float32) + bqkv_ref[l]
        # 128-aligned slices (q already carries the 1/sqrt(H) scale via Wq)
        q = qkv[:, 0 * LANE:0 * LANE + H].reshape(B, S, H)
        k = qkv[:, 1 * LANE:1 * LANE + H].reshape(B, S, H)
        v = qkv[:, 2 * LANE:2 * LANE + H].reshape(B, S, H)

        # --- attention (batched over B with einsum) --------------------------
        scores = jnp.einsum('bqd,bkd->bqk', q.astype(bf16), k.astype(bf16),
                            preferred_element_type=jnp.float32) + mask_add
        scores = scores - jnp.max(scores, axis=-1, keepdims=True)
        e = jnp.exp(scores)
        denom = jnp.sum(e, axis=-1, keepdims=True)
        probs = e * pl.reciprocal(denom, approx=True)      # EUP, not VALU divide
        ctx = jnp.einsum('bqk,bkd->bqd', probs.astype(bf16), v.astype(bf16),
                         preferred_element_type=jnp.float32)
        ctx2 = ctx.reshape(B * S, H)

        # --- packed per-layer H-wide vectors: [bo, ln1_g, ln1_b, bo2, ln2_g, ln2_b]
        vl = vecs_ref[l]                  # (6, H) f32
        bo, g1, b1 = vl[0:1], vl[1:2], vl[2:3]
        bo2, g2, b2 = vl[3:4], vl[4:5], vl[5:6]

        attn = jnp.dot(ctx2.astype(bf16), wo_ref[l],
                       preferred_element_type=jnp.float32) + bo
        h1 = _layernorm(x2 + attn, g1, b1)

        ff = _gelu(jnp.dot(h1.astype(bf16), wi_ref[l],
                           preferred_element_type=jnp.float32) + bi_ref[l])
        ff2 = jnp.dot(ff.astype(bf16), wo2_ref[l],
                      preferred_element_type=jnp.float32) + bo2
        h2 = _layernorm(h1 + ff2, g2, b2)

        h = h2.reshape(B, S, H)
        hs_ref[l + 1] = h
        layer_h.append(h)

    # --- fused CLS mean-pool over last 4 hidden states + classifier ----------
    cls4 = [hh[:, 0, :] for hh in layer_h[-4:]]            # each (B, H): h9..h12 CLS
    pooled = (cls4[0] + cls4[1] + cls4[2] + cls4[3]) * 0.25  # torch.mean(all_h, 1)
    # dropout is identity at inference (self.dropout in eval mode)
    logits_ref[...] = (jnp.dot(pooled.astype(bf16), clsw_ref[...],
                               preferred_element_type=jnp.float32) + clsb_ref[...])


# ---------------- wrapper ----------------
def bert_pool_clinical_forward(input_ids, attention_mask, params):
    B, S = input_ids.shape

    # --- embeddings (glue: gather + layernorm) ---
    emb = (params['word_emb'][input_ids]
           + params['pos_emb'][jnp.arange(S)][None]
           + params['type_emb'][0][None, None])
    h0 = _layernorm(emb, params['emb_ln_g'], params['emb_ln_b'])

    mask_add = ((1.0 - attention_mask.astype(jnp.float32)) * -10000.0
                ).reshape(B, 1, S)

    vmem = lambda: pl.BlockSpec(memory_space=pltpu.MemorySpace.VMEM)
    hs, logits_pad = pl.pallas_call(
        fused_bert_kernel,
        out_shape=(
            jax.ShapeDtypeStruct((NUM_LAYERS + 1, B, S, HIDDEN), jnp.float32),
            jax.ShapeDtypeStruct((B, CLS_COLS), jnp.float32),
        ),
        in_specs=[vmem() for _ in range(11)],
        out_specs=(vmem(), vmem()),
    )(h0, mask_add,
      params['wqkv'], params['bqkv'], params['wo'], params['wi'], params['wo2'],
      params['vecs'], params['bi'], params['cls_w'], params['cls_b'])

    logits = logits_pad[:, :NUM_LABELS]
    hidden_states = tuple(hs[i] for i in range(NUM_LAYERS + 1))

    # mimic `(logits,) + outputs[2:]`
    return (logits, hidden_states)


# ---------------- deterministic parameter init (packed for the kernel) ----------------
def init_params(key):
    nkeys = 3 + NUM_LAYERS * 6 + 1
    ks = iter(jax.random.split(key, nkeys))

    def w(shape):
        return (0.02 * jax.random.normal(next(ks), shape)).astype(jnp.float32)

    params = {
        'word_emb': w((VOCAB, HIDDEN)),
        'pos_emb': w((MAX_POS, HIDDEN)),
        'type_emb': w((2, HIDDEN)),
        'emb_ln_g': jnp.ones((HIDDEN,), jnp.float32),
        'emb_ln_b': jnp.zeros((HIDDEN,), jnp.float32),
    }

    wqkv_l, bqkv_l, wo_l, wi_l, wo2_l, vecs_l, bi_l = [], [], [], [], [], [], []
    for _ in range(NUM_LAYERS):
        # attention scale folded into Wq (bq is zero here; a nonzero bq would
        # also need the same scale fold).
        wq = w((HIDDEN, HIDDEN)) * ATTN_SCALE
        wk = w((HIDDEN, HIDDEN))
        wv = w((HIDDEN, HIDDEN))
        wqkv = jnp.zeros((HIDDEN, QKV_COLS), jnp.float32)
        wqkv = wqkv.at[:, 0 * LANE:0 * LANE + HIDDEN].set(wq)
        wqkv = wqkv.at[:, 1 * LANE:1 * LANE + HIDDEN].set(wk)
        wqkv = wqkv.at[:, 2 * LANE:2 * LANE + HIDDEN].set(wv)
        wqkv_l.append(wqkv)
        bqkv_l.append(jnp.zeros((1, QKV_COLS), jnp.float32))

        wo_l.append(w((HIDDEN, HIDDEN)))
        wi_l.append(w((HIDDEN, INTERMEDIATE)))
        wo2_l.append(w((INTERMEDIATE, HIDDEN)))

        # packed H-wide vectors: [bo, ln1_g, ln1_b, bo2, ln2_g, ln2_b]
        vecs_l.append(jnp.stack([
            jnp.zeros((HIDDEN,), jnp.float32),   # attention output bias
            jnp.ones((HIDDEN,), jnp.float32),    # LN1 gamma
            jnp.zeros((HIDDEN,), jnp.float32),   # LN1 beta
            jnp.zeros((HIDDEN,), jnp.float32),   # FFN output bias
            jnp.ones((HIDDEN,), jnp.float32),    # LN2 gamma
            jnp.zeros((HIDDEN,), jnp.float32),   # LN2 beta
        ], axis=0))
        bi_l.append(jnp.zeros((1, INTERMEDIATE), jnp.float32))

    # matmul operands stored in bf16 (f32 accumulation inside the kernel)
    params['wqkv'] = jnp.stack(wqkv_l).astype(jnp.bfloat16)   # (L, H, 384)
    params['bqkv'] = jnp.stack(bqkv_l)                        # (L, 1, 384) f32
    params['wo'] = jnp.stack(wo_l).astype(jnp.bfloat16)       # (L, H, H)
    params['wi'] = jnp.stack(wi_l).astype(jnp.bfloat16)       # (L, H, I)
    params['wo2'] = jnp.stack(wo2_l).astype(jnp.bfloat16)     # (L, I, H)
    params['vecs'] = jnp.stack(vecs_l)                        # (L, 6, H) f32
    params['bi'] = jnp.stack(bi_l)                            # (L, 1, I) f32

    # classifier: nn.Linear(hidden, num_labels), stored transposed and padded
    # to 128 output lanes (logits sliced back to 19 in the wrapper).
    cls_w = jnp.zeros((HIDDEN, CLS_COLS), jnp.float32)
    cls_w = cls_w.at[:, :NUM_LABELS].set(w((HIDDEN, NUM_LABELS)))
    params['cls_w'] = cls_w.astype(jnp.bfloat16)
    params['cls_b'] = jnp.zeros((1, CLS_COLS), jnp.float32)
    return params


if __name__ == "__main__":
    key = jax.random.PRNGKey(0)
    pk, ik = jax.random.split(key)
    params = init_params(pk)

    B, S = 2, 8
    input_ids = jax.random.randint(ik, (B, S), 0, VOCAB)
    attention_mask = jnp.ones((B, S), jnp.int32).at[1, 6:].set(0)

    outputs = bert_pool_clinical_forward(input_ids, attention_mask, params)
    logits = jax.block_until_ready(outputs[0])

    assert logits.shape == (B, NUM_LABELS)
    assert len(outputs[1]) == NUM_LAYERS + 1
    assert outputs[1][0].shape == (B, S, HIDDEN)
    print("KERNEL_OK")
</pallas_src>

<mosaic_0001>
module attributes {stable_mosaic.version = 11 : i64} {
  func.func @fused_bert_kernel(%arg0: memref<2x8x32xf32, #tpu.memory_space<vmem>>, %arg1: memref<2x1x8xf32, #tpu.memory_space<vmem>>, %arg2: memref<4x32x384xbf16, #tpu.memory_space<vmem>>, %arg3: memref<4x1x384xf32, #tpu.memory_space<vmem>>, %arg4: memref<4x32x32xbf16, #tpu.memory_space<vmem>>, %arg5: memref<4x32x64xbf16, #tpu.memory_space<vmem>>, %arg6: memref<4x64x32xbf16, #tpu.memory_space<vmem>>, %arg7: memref<4x6x32xf32, #tpu.memory_space<vmem>>, %arg8: memref<4x1x64xf32, #tpu.memory_space<vmem>>, %arg9: memref<32x128xbf16, #tpu.memory_space<vmem>>, %arg10: memref<1x128xf32, #tpu.memory_space<vmem>>, %arg11: memref<5x2x8x32xf32, #tpu.memory_space<vmem>>, %arg12: memref<2x128xf32, #tpu.memory_space<vmem>>) attributes {dimension_semantics = [], scalar_prefetch = 0 : i64, scratch_operands = 0 : i64, tpu.core_type = #tpu.core_type<tc>} {
    %c0 = arith.constant 0 : index
    %c0_0 = arith.constant 0 : index
    %c0_1 = arith.constant 0 : index
    %0 = vector.load %arg0[%c0, %c0_0, %c0_1] : memref<2x8x32xf32, #tpu.memory_space<vmem>>, vector<2x8x32xf32>
    %c0_2 = arith.constant 0 : index
    %c0_3 = arith.constant 0 : index
    %c0_4 = arith.constant 0 : index
    %c0_5 = arith.constant 0 : index
    %1 = vector.load %arg11[%c0_2, %c0_3, %c0_4, %c0_5] : memref<5x2x8x32xf32, #tpu.memory_space<vmem>>, vector<1x2x8x32xf32>
    %2 = vector.shape_cast %1 : vector<1x2x8x32xf32> to vector<2x8x32xf32>
    %3 = vector.shape_cast %0 : vector<2x8x32xf32> to vector<1x2x8x32xf32>
    tpu.vector_store %arg11[%c0_2, %c0_3, %c0_4, %c0_5], %3 {strides = array<i32>} : memref<5x2x8x32xf32, #tpu.memory_space<vmem>>, vector<1x2x8x32xf32>,
    %c0_6 = arith.constant 0 : index
    %c0_7 = arith.constant 0 : index
    %c0_8 = arith.constant 0 : index
    %4 = vector.load %arg1[%c0_6, %c0_7, %c0_8] : memref<2x1x8xf32, #tpu.memory_space<vmem>>, vector<2x1x8xf32>
    %5 = vector.shape_cast %0 : vector<2x8x32xf32> to vector<16x32xf32>
    %6 = arith.truncf %5 : vector<16x32xf32> to vector<16x32xbf16>
    %c0_9 = arith.constant 0 : index
    %c0_10 = arith.constant 0 : index
    %c0_11 = arith.constant 0 : index
    %7 = vector.load %arg2[%c0_9, %c0_10, %c0_11] : memref<4x32x384xbf16, #tpu.memory_space<vmem>>, vector<1x32x384xbf16>
    %8 = vector.shape_cast %7 : vector<1x32x384xbf16> to vector<32x384xbf16>
    %cst = arith.constant dense<0.000000e+00> : vector<16x384xf32>
    %9 = tpu.matmul %6, %8, %cst {dimension_numbers = #tpu.dot_dimension_numbers<[1], [0], [0], [1], [0, 0, 1, 1], [], []>} : vector<16x32xbf16>, vector<32x384xbf16>, vector<16x384xf32> -> vector<16x384xf32>
    %c0_12 = arith.constant 0 : index
    %c0_13 = arith.constant 0 : index
    %c0_14 = arith.constant 0 : index
    %10 = vector.load %arg3[%c0_12, %c0_13, %c0_14] : memref<4x1x384xf32, #tpu.memory_space<vmem>>, vector<1x1x384xf32>
    %11 = vector.shape_cast %10 : vector<1x1x384xf32> to vector<1x384xf32>
    %12 = vector.broadcast %11 : vector<1x384xf32> to vector<16x384xf32>
    %13 = arith.addf %9, %12 : vector<16x384xf32>
    %14 = vector.extract_strided_slice %13 {offsets = [0, 0], sizes = [16, 32], strides = [1, 1]} : vector<16x384xf32> to vector<16x32xf32>
    %15 = vector.shape_cast %14 : vector<16x32xf32> to vector<2x8x32xf32>
    %16 = vector.extract_strided_slice %13 {offsets = [0, 128], sizes = [16, 32], strides = [1, 1]} : vector<16x384xf32> to vector<16x32xf32>
    %17 = vector.shape_cast %16 : vector<16x32xf32> to vector<2x8x32xf32>
    %18 = vector.extract_strided_slice %13 {offsets = [0, 256], sizes = [16, 32], strides = [1, 1]} : vector<16x384xf32> to vector<16x32xf32>
    %19 = vector.shape_cast %18 : vector<16x32xf32> to vector<2x8x32xf32>
    %20 = arith.truncf %15 : vector<2x8x32xf32> to vector<2x8x32xbf16>
    %21 = arith.truncf %17 : vector<2x8x32xf32> to vector<2x8x32xbf16>
    "tpu.trace_start"() <{level = 10 : i32, message = "bqd,bkd->bqk"}> : () -> ()
    %cst_15 = arith.constant dense<0.000000e+00> : vector<2x8x8xf32>
    %22 = tpu.matmul %20, %21, %cst_15 {dimension_numbers = #tpu.dot_dimension_numbers<[2], [2], [1], [1], [0, 0, 0, 1, 1, 1], [0], [0]>} : vector<2x8x32xbf16>, vector<2x8x32xbf16>, vector<2x8x8xf32> -> vector<2x8x8xf32>
    "tpu.trace_stop"() : () -> ()
    %23 = vector.broadcast %4 : vector<2x1x8xf32> to vector<2x8x8xf32>
    %24 = arith.addf %22, %23 : vector<2x8x8xf32>
    %cst_16 = arith.constant dense<0xFF800000> : vector<2x8xf32>
    %25 = vector.multi_reduction <maximumf>, %24, %cst_16 [2] : vector<2x8x8xf32> to vector<2x8xf32>
    %26 = vector.shape_cast %25 : vector<2x8xf32> to vector<2x8x1xf32>
    %27 = vector.broadcast %26 : vector<2x8x1xf32> to vector<2x8x8xf32>
    %28 = arith.subf %24, %27 : vector<2x8x8xf32>
    %29 = math.exp %28 : vector<2x8x8xf32>
    %cst_17 = arith.constant dense<0.000000e+00> : vector<2x8xf32>
    %30 = vector.multi_reduction <add>, %29, %cst_17 [2] : vector<2x8x8xf32> to vector<2x8xf32>
    %31 = vector.shape_cast %30 : vector<2x8xf32> to vector<2x8x1xf32>
    %32 = tpu.reciprocal %31 {approx = true} : vector<2x8x1xf32> -> vector<2x8x1xf32>
    %33 = vector.broadcast %32 : vector<2x8x1xf32> to vector<2x8x8xf32>
    %34 = arith.mulf %29, %33 : vector<2x8x8xf32>
    %35 = arith.truncf %34 : vector<2x8x8xf32> to vector<2x8x8xbf16>
    %36 = arith.truncf %19 : vector<2x8x32xf32> to vector<2x8x32xbf16>
    "tpu.trace_start"() <{level = 10 : i32, message = "bqk,bkd->bqd"}> : () -> ()
    %cst_18 = arith.constant dense<0.000000e+00> : vector<2x8x32xf32>
    %37 = tpu.matmul %35, %36, %cst_18 {dimension_numbers = #tpu.dot_dimension_numbers<[2], [1], [1], [2], [0, 0, 0, 1, 1, 2], [0], [0]>} : vector<2x8x8xbf16>, vector<2x8x32xbf16>, vector<2x8x32xf32> -> vector<2x8x32xf32>
    "tpu.trace_stop"() : () -> ()
    %38 = vector.shape_cast %37 : vector<2x8x32xf32> to vector<16x32xf32>
    %c0_19 = arith.constant 0 : index
    %c0_20 = arith.constant 0 : index
    %c0_21 = arith.constant 0 : index
    %39 = vector.load %arg7[%c0_19, %c0_20, %c0_21] : memref<4x6x32xf32, #tpu.memory_space<vmem>>, vector<1x6x32xf32>
    %40 = vector.shape_cast %39 : vector<1x6x32xf32> to vector<6x32xf32>
    %41 = vector.extract_strided_slice %40 {offsets = [0, 0], sizes = [1, 32], strides = [1, 1]} : vector<6x32xf32> to vector<1x32xf32>
    %42 = vector.extract_strided_slice %40 {offsets = [1, 0], sizes = [1, 32], strides = [1, 1]} : vector<6x32xf32> to vector<1x32xf32>
    %43 = vector.extract_strided_slice %40 {offsets = [2, 0], sizes = [1, 32], strides = [1, 1]} : vector<6x32xf32> to vector<1x32xf32>
    %44 = vector.extract_strided_slice %40 {offsets = [3, 0], sizes = [1, 32], strides = [1, 1]} : vector<6x32xf32> to vector<1x32xf32>
    %45 = vector.extract_strided_slice %40 {offsets = [4, 0], sizes = [1, 32], strides = [1, 1]} : vector<6x32xf32> to vector<1x32xf32>
    %46 = vector.extract_strided_slice %40 {offsets = [5, 0], sizes = [1, 32], strides = [1, 1]} : vector<6x32xf32> to vector<1x32xf32>
    %47 = arith.truncf %38 : vector<16x32xf32> to vector<16x32xbf16>
    %c0_22 = arith.constant 0 : index
    %c0_23 = arith.constant 0 : index
    %c0_24 = arith.constant 0 : index
    %48 = vector.load %arg4[%c0_22, %c0_23, %c0_24] : memref<4x32x32xbf16, #tpu.memory_space<vmem>>, vector<1x32x32xbf16>
    %49 = vector.shape_cast %48 : vector<1x32x32xbf16> to vector<32x32xbf16>
    %cst_25 = arith.constant dense<0.000000e+00> : vector<16x32xf32>
    %50 = tpu.matmul %47, %49, %cst_25 {dimension_numbers = #tpu.dot_dimension_numbers<[1], [0], [0], [1], [0, 0, 1, 1], [], []>} : vector<16x32xbf16>, vector<32x32xbf16>, vector<16x32xf32> -> vector<16x32xf32>
    %51 = vector.broadcast %41 : vector<1x32xf32> to vector<16x32xf32>
    %52 = arith.addf %50, %51 : vector<16x32xf32>
    %53 = arith.addf %5, %52 : vector<16x32xf32>
    %cst_26 = arith.constant dense<0.000000e+00> : vector<16xf32>
    %54 = vector.multi_reduction <add>, %53, %cst_26 [1] : vector<16x32xf32> to vector<16xf32>
    %55 = vector.shape_cast %54 : vector<16xf32> to vector<16x1xf32>
    %cst_27 = arith.constant 3.200000e+01 : f32
    %56 = vector.broadcast %cst_27 : f32 to vector<16x1xf32>
    %57 = arith.divf %55, %56 : vector<16x1xf32>
    %58 = vector.broadcast %57 : vector<16x1xf32> to vector<16x32xf32>
    %59 = arith.subf %53, %58 : vector<16x32xf32>
    %60 = arith.mulf %59, %59 : vector<16x32xf32>
    %cst_28 = arith.constant dense<0.000000e+00> : vector<16xf32>
    %61 = vector.multi_reduction <add>, %60, %cst_28 [1] : vector<16x32xf32> to vector<16xf32>
    %62 = vector.shape_cast %61 : vector<16xf32> to vector<16x1xf32>
    %cst_29 = arith.constant 3.200000e+01 : f32
    %63 = vector.broadcast %cst_29 : f32 to vector<16x1xf32>
    %64 = arith.divf %62, %63 : vector<16x1xf32>
    %65 = vector.broadcast %57 : vector<16x1xf32> to vector<16x32xf32>
    %66 = arith.subf %53, %65 : vector<16x32xf32>
    %cst_30 = arith.constant 9.99999996E-13 : f32
    %67 = vector.broadcast %cst_30 : f32 to vector<16x1xf32>
    %68 = arith.addf %64, %67 : vector<16x1xf32>
    %69 = math.rsqrt %68 : vector<16x1xf32>
    %70 = vector.broadcast %69 : vector<16x1xf32> to vector<16x32xf32>
    %71 = arith.mulf %66, %70 : vector<16x32xf32>
    %72 = vector.broadcast %42 : vector<1x32xf32> to vector<16x32xf32>
    %73 = arith.mulf %71, %72 : vector<16x32xf32>
    %74 = vector.broadcast %43 : vector<1x32xf32> to vector<16x32xf32>
    %75 = arith.addf %73, %74 : vector<16x32xf32>
    %76 = arith.truncf %75 : vector<16x32xf32> to vector<16x32xbf16>
    %c0_31 = arith.constant 0 : index
    %c0_32 = arith.constant 0 : index
    %c0_33 = arith.constant 0 : index
    %77 = vector.load %arg5[%c0_31, %c0_32, %c0_33] : memref<4x32x64xbf16, #tpu.memory_space<vmem>>, vector<1x32x64xbf16>
    %78 = vector.shape_cast %77 : vector<1x32x64xbf16> to vector<32x64xbf16>
    %cst_34 = arith.constant dense<0.000000e+00> : vector<16x64xf32>
    %79 = tpu.matmul %76, %78, %cst_34 {dimension_numbers = #tpu.dot_dimension_numbers<[1], [0], [0], [1], [0, 0, 1, 1], [], []>} : vector<16x32xbf16>, vector<32x64xbf16>, vector<16x64xf32> -> vector<16x64xf32>
    %c0_35 = arith.constant 0 : index
    %c0_36 = arith.constant 0 : index
    %c0_37 = arith.constant 0 : index
    %80 = vector.load %arg8[%c0_35, %c0_36, %c0_37] : memref<4x1x64xf32, #tpu.memory_space<vmem>>, vector<1x1x64xf32>
    %81 = vector.shape_cast %80 : vector<1x1x64xf32> to vector<1x64xf32>
    %82 = vector.broadcast %81 : vector<1x64xf32> to vector<16x64xf32>
    %83 = arith.addf %79, %82 : vector<16x64xf32>
    %cst_38 = arith.constant 5.000000e-01 : f32
    %84 = vector.broadcast %cst_38 : f32 to vector<16x64xf32>
    %85 = arith.mulf %84, %83 : vector<16x64xf32>
    %cst_39 = arith.constant 4.471500e-02 : f32
    %86 = vector.broadcast %cst_39 : f32 to vector<16x64xf32>
    %87 = arith.mulf %86, %83 : vector<16x64xf32>
    %88 = arith.mulf %87, %83 : vector<16x64xf32>
    %89 = arith.mulf %88, %83 : vector<16x64xf32>
    %90 = arith.addf %83, %89 : vector<16x64xf32>
    %cst_40 = arith.constant 0.797884583 : f32
    %91 = vector.broadcast %cst_40 : f32 to vector<16x64xf32>
    %92 = arith.mulf %91, %90 : vector<16x64xf32>
    %93 = math.tanh %92 : vector<16x64xf32>
    %cst_41 = arith.constant 1.000000e+00 : f32
    %94 = vector.broadcast %cst_41 : f32 to vector<16x64xf32>
    %95 = arith.addf %94, %93 : vector<16x64xf32>
    %96 = arith.mulf %85, %95 : vector<16x64xf32>
    %97 = arith.truncf %96 : vector<16x64xf32> to vector<16x64xbf16>
    %c0_42 = arith.constant 0 : index
    %c0_43 = arith.constant 0 : index
    %c0_44 = arith.constant 0 : index
    %98 = vector.load %arg6[%c0_42, %c0_43, %c0_44] : memref<4x64x32xbf16, #tpu.memory_space<vmem>>, vector<1x64x32xbf16>
    %99 = vector.shape_cast %98 : vector<1x64x32xbf16> to vector<64x32xbf16>
    %cst_45 = arith.constant dense<0.000000e+00> : vector<16x32xf32>
    %100 = tpu.matmul %97, %99, %cst_45 {dimension_numbers = #tpu.dot_dimension_numbers<[1], [0], [0], [1], [0, 0, 1, 1], [], []>} : vector<16x64xbf16>, vector<64x32xbf16>, vector<16x32xf32> -> vector<16x32xf32>
    %101 = vector.broadcast %44 : vector<1x32xf32> to vector<16x32xf32>
    %102 = arith.addf %100, %101 : vector<16x32xf32>
    %103 = arith.addf %75, %102 : vector<16x32xf32>
    %cst_46 = arith.constant dense<0.000000e+00> : vector<16xf32>
    %104 = vector.multi_reduction <add>, %103, %cst_46 [1] : vector<16x32xf32> to vector<16xf32>
    %105 = vector.shape_cast %104 : vector<16xf32> to vector<16x1xf32>
    %cst_47 = arith.constant 3.200000e+01 : f32
    %106 = vector.broadcast %cst_47 : f32 to vector<16x1xf32>
    %107 = arith.divf %105, %106 : vector<16x1xf32>
    %108 = vector.broadcast %107 : vector<16x1xf32> to vector<16x32xf32>
    %109 = arith.subf %103, %108 : vector<16x32xf32>
    %110 = arith.mulf %109, %109 : vector<16x32xf32>
    %cst_48 = arith.constant dense<0.000000e+00> : vector<16xf32>
    %111 = vector.multi_reduction <add>, %110, %cst_48 [1] : vector<16x32xf32> to vector<16xf32>
    %112 = vector.shape_cast %111 : vector<16xf32> to vector<16x1xf32>
    %cst_49 = arith.constant 3.200000e+01 : f32
    %113 = vector.broadcast %cst_49 : f32 to vector<16x1xf32>
    %114 = arith.divf %112, %113 : vector<16x1xf32>
    %115 = vector.broadcast %107 : vector<16x1xf32> to vector<16x32xf32>
    %116 = arith.subf %103, %115 : vector<16x32xf32>
    %cst_50 = arith.constant 9.99999996E-13 : f32
    %117 = vector.broadcast %cst_50 : f32 to vector<16x1xf32>
    %118 = arith.addf %114, %117 : vector<16x1xf32>
    %119 = math.rsqrt %118 : vector<16x1xf32>
    %120 = vector.broadcast %119 : vector<16x1xf32> to vector<16x32xf32>
    %121 = arith.mulf %116, %120 : vector<16x32xf32>
    %122 = vector.broadcast %45 : vector<1x32xf32> to vector<16x32xf32>
    %123 = arith.mulf %121, %122 : vector<16x32xf32>
    %124 = vector.broadcast %46 : vector<1x32xf32> to vector<16x32xf32>
    %125 = arith.addf %123, %124 : vector<16x32xf32>
    %126 = vector.shape_cast %125 : vector<16x32xf32> to vector<2x8x32xf32>
    %c1 = arith.constant 1 : index
    %c0_51 = arith.constant 0 : index
    %c0_52 = arith.constant 0 : index
    %c0_53 = arith.constant 0 : index
    %127 = vector.load %arg11[%c1, %c0_51, %c0_52, %c0_53] : memref<5x2x8x32xf32, #tpu.memory_space<vmem>>, vector<1x2x8x32xf32>
    %128 = vector.shape_cast %127 : vector<1x2x8x32xf32> to vector<2x8x32xf32>
    %129 = vector.shape_cast %126 : vector<2x8x32xf32> to vector<1x2x8x32xf32>
    tpu.vector_store %arg11[%c1, %c0_51, %c0_52, %c0_53], %129 {strides = array<i32>} : memref<5x2x8x32xf32, #tpu.memory_space<vmem>>, vector<1x2x8x32xf32>,
    %130 = vector.shape_cast %126 : vector<2x8x32xf32> to vector<16x32xf32>
    %131 = arith.truncf %130 : vector<16x32xf32> to vector<16x32xbf16>
    %c1_54 = arith.constant 1 : index
    %c0_55 = arith.constant 0 : index
    %c0_56 = arith.constant 0 : index
    %132 = vector.load %arg2[%c1_54, %c0_55, %c0_56] : memref<4x32x384xbf16, #tpu.memory_space<vmem>>, vector<1x32x384xbf16>
    %133 = vector.shape_cast %132 : vector<1x32x384xbf16> to vector<32x384xbf16>
    %cst_57 = arith.constant dense<0.000000e+00> : vector<16x384xf32>
    %134 = tpu.matmul %131, %133, %cst_57 {dimension_numbers = #tpu.dot_dimension_numbers<[1], [0], [0], [1], [0, 0, 1, 1], [], []>} : vector<16x32xbf16>, vector<32x384xbf16>, vector<16x384xf32> -> vector<16x384xf32>
    %c1_58 = arith.constant 1 : index
    %c0_59 = arith.constant 0 : index
    %c0_60 = arith.constant 0 : index
    %135 = vector.load %arg3[%c1_58, %c0_59, %c0_60] : memref<4x1x384xf32, #tpu.memory_space<vmem>>, vector<1x1x384xf32>
    %136 = vector.shape_cast %135 : vector<1x1x384xf32> to vector<1x384xf32>
    %137 = vector.broadcast %136 : vector<1x384xf32> to vector<16x384xf32>
    %138 = arith.addf %134, %137 : vector<16x384xf32>
    %139 = vector.extract_strided_slice %138 {offsets = [0, 0], sizes = [16, 32], strides = [1, 1]} : vector<16x384xf32> to vector<16x32xf32>
    %140 = vector.shape_cast %139 : vector<16x32xf32> to vector<2x8x32xf32>
    %141 = vector.extract_strided_slice %138 {offsets = [0, 128], sizes = [16, 32], strides = [1, 1]} : vector<16x384xf32> to vector<16x32xf32>
    %142 = vector.shape_cast %141 : vector<16x32xf32> to vector<2x8x32xf32>
    %143 = vector.extract_strided_slice %138 {offsets = [0, 256], sizes = [16, 32], strides = [1, 1]} : vector<16x384xf32> to vector<16x32xf32>
    %144 = vector.shape_cast %143 : vector<16x32xf32> to vector<2x8x32xf32>
    %145 = arith.truncf %140 : vector<2x8x32xf32> to vector<2x8x32xbf16>
    %146 = arith.truncf %142 : vector<2x8x32xf32> to vector<2x8x32xbf16>
    "tpu.trace_start"() <{level = 10 : i32, message = "bqd,bkd->bqk"}> : () -> ()
    %cst_61 = arith.constant dense<0.000000e+00> : vector<2x8x8xf32>
    %147 = tpu.matmul %145, %146, %cst_61 {dimension_numbers = #tpu.dot_dimension_numbers<[2], [2], [1], [1], [0, 0, 0, 1, 1, 1], [0], [0]>} : vector<2x8x32xbf16>, vector<2x8x32xbf16>, vector<2x8x8xf32> -> vector<2x8x8xf32>
    "tpu.trace_stop"() : () -> ()
    %148 = vector.broadcast %4 : vector<2x1x8xf32> to vector<2x8x8xf32>
    %149 = arith.addf %147, %148 : vector<2x8x8xf32>
    %cst_62 = arith.constant dense<0xFF800000> : vector<2x8xf32>
    %150 = vector.multi_reduction <maximumf>, %149, %cst_62 [2] : vector<2x8x8xf32> to vector<2x8xf32>
    %151 = vector.shape_cast %150 : vector<2x8xf32> to vector<2x8x1xf32>
    %152 = vector.broadcast %151 : vector<2x8x1xf32> to vector<2x8x8xf32>
    %153 = arith.subf %149, %152 : vector<2x8x8xf32>
    %154 = math.exp %153 : vector<2x8x8xf32>
    %cst_63 = arith.constant dense<0.000000e+00> : vector<2x8xf32>
    %155 = vector.multi_reduction <add>, %154, %cst_63 [2] : vector<2x8x8xf32> to vector<2x8xf32>
    %156 = vector.shape_cast %155 : vector<2x8xf32> to vector<2x8x1xf32>
    %157 = tpu.reciprocal %156 {approx = true} : vector<2x8x1xf32> -> vector<2x8x1xf32>
    %158 = vector.broadcast %157 : vector<2x8x1xf32> to vector<2x8x8xf32>
    %159 = arith.mulf %154, %158 : vector<2x8x8xf32>
    %160 = arith.truncf %159 : vector<2x8x8xf32> to vector<2x8x8xbf16>
    %161 = arith.truncf %144 : vector<2x8x32xf32> to vector<2x8x32xbf16>
    "tpu.trace_start"() <{level = 10 : i32, message = "bqk,bkd->bqd"}> : () -> ()
    %cst_64 = arith.constant dense<0.000000e+00> : vector<2x8x32xf32>
    %162 = tpu.matmul %160, %161, %cst_64 {dimension_numbers = #tpu.dot_dimension_numbers<[2], [1], [1], [2], [0, 0, 0, 1, 1, 2], [0], [0]>} : vector<2x8x8xbf16>, vector<2x8x32xbf16>, vector<2x8x32xf32> -> vector<2x8x32xf32>
    "tpu.trace_stop"() : () -> ()
    %163 = vector.shape_cast %162 : vector<2x8x32xf32> to vector<16x32xf32>
    %c1_65 = arith.constant 1 : index
    %c0_66 = arith.constant 0 : index
    %c0_67 = arith.constant 0 : index
    %164 = vector.load %arg7[%c1_65, %c0_66, %c0_67] : memref<4x6x32xf32, #tpu.memory_space<vmem>>, vector<1x6x32xf32>
    %165 = vector.shape_cast %164 : vector<1x6x32xf32> to vector<6x32xf32>
    %166 = vector.extract_strided_slice %165 {offsets = [0, 0], sizes = [1, 32], strides = [1, 1]} : vector<6x32xf32> to vector<1x32xf32>
    %167 = vector.extract_strided_slice %165 {offsets = [1, 0], sizes = [1, 32], strides = [1, 1]} : vector<6x32xf32> to vector<1x32xf32>
    %168 = vector.extract_strided_slice %165 {offsets = [2, 0], sizes = [1, 32], strides = [1, 1]} : vector<6x32xf32> to vector<1x32xf32>
    %169 = vector.extract_strided_slice %165 {offsets = [3, 0], sizes = [1, 32], strides = [1, 1]} : vector<6x32xf32> to vector<1x32xf32>
    %170 = vector.extract_strided_slice %165 {offsets = [4, 0], sizes = [1, 32], strides = [1, 1]} : vector<6x32xf32> to vector<1x32xf32>
    %171 = vector.extract_strided_slice %165 {offsets = [5, 0], sizes = [1, 32], strides = [1, 1]} : vector<6x32xf32> to vector<1x32xf32>
    %172 = arith.truncf %163 : vector<16x32xf32> to vector<16x32xbf16>
    %c1_68 = arith.constant 1 : index
    %c0_69 = arith.constant 0 : index
    %c0_70 = arith.constant 0 : index
    %173 = vector.load %arg4[%c1_68, %c0_69, %c0_70] : memref<4x32x32xbf16, #tpu.memory_space<vmem>>, vector<1x32x32xbf16>
    %174 = vector.shape_cast %173 : vector<1x32x32xbf16> to vector<32x32xbf16>
    %cst_71 = arith.constant dense<0.000000e+00> : vector<16x32xf32>
    %175 = tpu.matmul %172, %174, %cst_71 {dimension_numbers = #tpu.dot_dimension_numbers<[1], [0], [0], [1], [0, 0, 1, 1], [], []>} : vector<16x32xbf16>, vector<32x32xbf16>, vector<16x32xf32> -> vector<16x32xf32>
    %176 = vector.broadcast %166 : vector<1x32xf32> to vector<16x32xf32>
    %177 = arith.addf %175, %176 : vector<16x32xf32>
    %178 = arith.addf %130, %177 : vector<16x32xf32>
    %cst_72 = arith.constant dense<0.000000e+00> : vector<16xf32>
    %179 = vector.multi_reduction <add>, %178, %cst_72 [1] : vector<16x32xf32> to vector<16xf32>
    %180 = vector.shape_cast %179 : vector<16xf32> to vector<16x1xf32>
    %cst_73 = arith.constant 3.200000e+01 : f32
    %181 = vector.broadcast %cst_73 : f32 to vector<16x1xf32>
    %182 = arith.divf %180, %181 : vector<16x1xf32>
    %183 = vector.broadcast %182 : vector<16x1xf32> to vector<16x32xf32>
    %184 = arith.subf %178, %183 : vector<16x32xf32>
    %185 = arith.mulf %184, %184 : vector<16x32xf32>
    %cst_74 = arith.constant dense<0.000000e+00> : vector<16xf32>
    %186 = vector.multi_reduction <add>, %185, %cst_74 [1] : vector<16x32xf32> to vector<16xf32>
    %187 = vector.shape_cast %186 : vector<16xf32> to vector<16x1xf32>
    %cst_75 = arith.constant 3.200000e+01 : f32
    %188 = vector.broadcast %cst_75 : f32 to vector<16x1xf32>
    %189 = arith.divf %187, %188 : vector<16x1xf32>
    %190 = vector.broadcast %182 : vector<16x1xf32> to vector<16x32xf32>
    %191 = arith.subf %178, %190 : vector<16x32xf32>
    %cst_76 = arith.constant 9.99999996E-13 : f32
    %192 = vector.broadcast %cst_76 : f32 to vector<16x1xf32>
    %193 = arith.addf %189, %192 : vector<16x1xf32>
    %194 = math.rsqrt %193 : vector<16x1xf32>
    %195 = vector.broadcast %194 : vector<16x1xf32> to vector<16x32xf32>
    %196 = arith.mulf %191, %195 : vector<16x32xf32>
    %197 = vector.broadcast %167 : vector<1x32xf32> to vector<16x32xf32>
    %198 = arith.mulf %196, %197 : vector<16x32xf32>
    %199 = vector.broadcast %168 : vector<1x32xf32> to vector<16x32xf32>
    %200 = arith.addf %198, %199 : vector<16x32xf32>
    %201 = arith.truncf %200 : vector<16x32xf32> to vector<16x32xbf16>
    %c1_77 = arith.constant 1 : index
    %c0_78 = arith.constant 0 : index
    %c0_79 = arith.constant 0 : index
    %202 = vector.load %arg5[%c1_77, %c0_78, %c0_79] : memref<4x32x64xbf16, #tpu.memory_space<vmem>>, vector<1x32x64xbf16>
    %203 = vector.shape_cast %202 : vector<1x32x64xbf16> to vector<32x64xbf16>
    %cst_80 = arith.constant dense<0.000000e+00> : vector<16x64xf32>
    %204 = tpu.matmul %201, %203, %cst_80 {dimension_numbers = #tpu.dot_dimension_numbers<[1], [0], [0], [1], [0, 0, 1, 1], [], []>} : vector<16x32xbf16>, vector<32x64xbf16>, vector<16x64xf32> -> vector<16x64xf32>
    %c1_81 = arith.constant 1 : index
    %c0_82 = arith.constant 0 : index
    %c0_83 = arith.constant 0 : index
    %205 = vector.load %arg8[%c1_81, %c0_82, %c0_83] : memref<4x1x64xf32, #tpu.memory_space<vmem>>, vector<1x1x64xf32>
    %206 = vector.shape_cast %205 : vector<1x1x64xf32> to vector<1x64xf32>
    %207 = vector.broadcast %206 : vector<1x64xf32> to vector<16x64xf32>
    %208 = arith.addf %204, %207 : vector<16x64xf32>
    %cst_84 = arith.constant 5.000000e-01 : f32
    %209 = vector.broadcast %cst_84 : f32 to vector<16x64xf32>
    %210 = arith.mulf %209, %208 : vector<16x64xf32>
    %cst_85 = arith.constant 4.471500e-02 : f32
    %211 = vector.broadcast %cst_85 : f32 to vector<16x64xf32>
    %212 = arith.mulf %211, %208 : vector<16x64xf32>
    %213 = arith.mulf %212, %208 : vector<16x64xf32>
    %214 = arith.mulf %213, %208 : vector<16x64xf32>
    %215 = arith.addf %208, %214 : vector<16x64xf32>
    %cst_86 = arith.constant 0.797884583 : f32
    %216 = vector.broadcast %cst_86 : f32 to vector<16x64xf32>
    %217 = arith.mulf %216, %215 : vector<16x64xf32>
    %218 = math.tanh %217 : vector<16x64xf32>
    %cst_87 = arith.constant 1.000000e+00 : f32
    %219 = vector.broadcast %cst_87 : f32 to vector<16x64xf32>
    %220 = arith.addf %219, %218 : vector<16x64xf32>
    %221 = arith.mulf %210, %220 : vector<16x64xf32>
    %222 = arith.truncf %221 : vector<16x64xf32> to vector<16x64xbf16>
    %c1_88 = arith.constant 1 : index
    %c0_89 = arith.constant 0 : index
    %c0_90 = arith.constant 0 : index
    %223 = vector.load %arg6[%c1_88, %c0_89, %c0_90] : memref<4x64x32xbf16, #tpu.memory_space<vmem>>, vector<1x64x32xbf16>
    %224 = vector.shape_cast %223 : vector<1x64x32xbf16> to vector<64x32xbf16>
    %cst_91 = arith.constant dense<0.000000e+00> : vector<16x32xf32>
    %225 = tpu.matmul %222, %224, %cst_91 {dimension_numbers = #tpu.dot_dimension_numbers<[1], [0], [0], [1], [0, 0, 1, 1], [], []>} : vector<16x64xbf16>, vector<64x32xbf16>, vector<16x32xf32> -> vector<16x32xf32>
    %226 = vector.broadcast %169 : vector<1x32xf32> to vector<16x32xf32>
    %227 = arith.addf %225, %226 : vector<16x32xf32>
    %228 = arith.addf %200, %227 : vector<16x32xf32>
    %cst_92 = arith.constant dense<0.000000e+00> : vector<16xf32>
    %229 = vector.multi_reduction <add>, %228, %cst_92 [1] : vector<16x32xf32> to vector<16xf32>
    %230 = vector.shape_cast %229 : vector<16xf32> to vector<16x1xf32>
    %cst_93 = arith.constant 3.200000e+01 : f32
    %231 = vector.broadcast %cst_93 : f32 to vector<16x1xf32>
    %232 = arith.divf %230, %231 : vector<16x1xf32>
    %233 = vector.broadcast %232 : vector<16x1xf32> to vector<16x32xf32>
    %234 = arith.subf %228, %233 : vector<16x32xf32>
    %235 = arith.mulf %234, %234 : vector<16x32xf32>
    %cst_94 = arith.constant dense<0.000000e+00> : vector<16xf32>
    %236 = vector.multi_reduction <add>, %235, %cst_94 [1] : vector<16x32xf32> to vector<16xf32>
    %237 = vector.shape_cast %236 : vector<16xf32> to vector<16x1xf32>
    %cst_95 = arith.constant 3.200000e+01 : f32
    %238 = vector.broadcast %cst_95 : f32 to vector<16x1xf32>
    %239 = arith.divf %237, %238 : vector<16x1xf32>
    %240 = vector.broadcast %232 : vector<16x1xf32> to vector<16x32xf32>
    %241 = arith.subf %228, %240 : vector<16x32xf32>
    %cst_96 = arith.constant 9.99999996E-13 : f32
    %242 = vector.broadcast %cst_96 : f32 to vector<16x1xf32>
    %243 = arith.addf %239, %242 : vector<16x1xf32>
    %244 = math.rsqrt %243 : vector<16x1xf32>
    %245 = vector.broadcast %244 : vector<16x1xf32> to vector<16x32xf32>
    %246 = arith.mulf %241, %245 : vector<16x32xf32>
    %247 = vector.broadcast %170 : vector<1x32xf32> to vector<16x32xf32>
    %248 = arith.mulf %246, %247 : vector<16x32xf32>
    %249 = vector.broadcast %171 : vector<1x32xf32> to vector<16x32xf32>
    %250 = arith.addf %248, %249 : vector<16x32xf32>
    %251 = vector.shape_cast %250 : vector<16x32xf32> to vector<2x8x32xf32>
    %c2 = arith.constant 2 : index
    %c0_97 = arith.constant 0 : index
    %c0_98 = arith.constant 0 : index
    %c0_99 = arith.constant 0 : index
    %252 = vector.load %arg11[%c2, %c0_97, %c0_98, %c0_99] : memref<5x2x8x32xf32, #tpu.memory_space<vmem>>, vector<1x2x8x32xf32>
    %253 = vector.shape_cast %252 : vector<1x2x8x32xf32> to vector<2x8x32xf32>
    %254 = vector.shape_cast %251 : vector<2x8x32xf32> to vector<1x2x8x32xf32>
    tpu.vector_store %arg11[%c2, %c0_97, %c0_98, %c0_99], %254 {strides = array<i32>} : memref<5x2x8x32xf32, #tpu.memory_space<vmem>>, vector<1x2x8x32xf32>,
    %255 = vector.shape_cast %251 : vector<2x8x32xf32> to vector<16x32xf32>
    %256 = arith.truncf %255 : vector<16x32xf32> to vector<16x32xbf16>
    %c2_100 = arith.constant 2 : index
    %c0_101 = arith.constant 0 : index
    %c0_102 = arith.constant 0 : index
    %257 = vector.load %arg2[%c2_100, %c0_101, %c0_102] : memref<4x32x384xbf16, #tpu.memory_space<vmem>>, vector<1x32x384xbf16>
    %258 = vector.shape_cast %257 : vector<1x32x384xbf16> to vector<32x384xbf16>
    %cst_103 = arith.constant dense<0.000000e+00> : vector<16x384xf32>
    %259 = tpu.matmul %256, %258, %cst_103 {dimension_numbers = #tpu.dot_dimension_numbers<[1], [0], [0], [1], [0, 0, 1, 1], [], []>} : vector<16x32xbf16>, vector<32x384xbf16>, vector<16x384xf32> -> vector<16x384xf32>
    %c2_104 = arith.constant 2 : index
    %c0_105 = arith.constant 0 : index
    %c0_106 = arith.constant 0 : index
    %260 = vector.load %arg3[%c2_104, %c0_105, %c0_106] : memref<4x1x384xf32, #tpu.memory_space<vmem>>, vector<1x1x384xf32>
    %261 = vector.shape_cast %260 : vector<1x1x384xf32> to vector<1x384xf32>
    %262 = vector.broadcast %261 : vector<1x384xf32> to vector<16x384xf32>
    %263 = arith.addf %259, %262 : vector<16x384xf32>
    %264 = vector.extract_strided_slice %263 {offsets = [0, 0], sizes = [16, 32], strides = [1, 1]} : vector<16x384xf32> to vector<16x32xf32>
    %265 = vector.shape_cast %264 : vector<16x32xf32> to vector<2x8x32xf32>
    %266 = vector.extract_strided_slice %263 {offsets = [0, 128], sizes = [16, 32], strides = [1, 1]} : vector<16x384xf32> to vector<16x32xf32>
    %267 = vector.shape_cast %266 : vector<16x32xf32> to vector<2x8x32xf32>
    %268 = vector.extract_strided_slice %263 {offsets = [0, 256], sizes = [16, 32], strides = [1, 1]} : vector<16x384xf32> to vector<16x32xf32>
    %269 = vector.shape_cast %268 : vector<16x32xf32> to vector<2x8x32xf32>
    %270 = arith.truncf %265 : vector<2x8x32xf32> to vector<2x8x32xbf16>
    %271 = arith.truncf %267 : vector<2x8x32xf32> to vector<2x8x32xbf16>
    "tpu.trace_start"() <{level = 10 : i32, message = "bqd,bkd->bqk"}> : () -> ()
    %cst_107 = arith.constant dense<0.000000e+00> : vector<2x8x8xf32>
    %272 = tpu.matmul %270, %271, %cst_107 {dimension_numbers = #tpu.dot_dimension_numbers<[2], [2], [1], [1], [0, 0, 0, 1, 1, 1], [0], [0]>} : vector<2x8x32xbf16>, vector<2x8x32xbf16>, vector<2x8x8xf32> -> vector<2x8x8xf32>
    "tpu.trace_stop"() : () -> ()
    %273 = vector.broadcast %4 : vector<2x1x8xf32> to vector<2x8x8xf32>
    %274 = arith.addf %272, %273 : vector<2x8x8xf32>
    %cst_108 = arith.constant dense<0xFF800000> : vector<2x8xf32>
    %275 = vector.multi_reduction <maximumf>, %274, %cst_108 [2] : vector<2x8x8xf32> to vector<2x8xf32>
    %276 = vector.shape_cast %275 : vector<2x8xf32> to vector<2x8x1xf32>
    %277 = vector.broadcast %276 : vector<2x8x1xf32> to vector<2x8x8xf32>
    %278 = arith.subf %274, %277 : vector<2x8x8xf32>
    %279 = math.exp %278 : vector<2x8x8xf32>
    %cst_109 = arith.constant dense<0.000000e+00> : vector<2x8xf32>
    %280 = vector.multi_reduction <add>, %279, %cst_109 [2] : vector<2x8x8xf32> to vector<2x8xf32>
    %281 = vector.shape_cast %280 : vector<2x8xf32> to vector<2x8x1xf32>
    %282 = tpu.reciprocal %281 {approx = true} : vector<2x8x1xf32> -> vector<2x8x1xf32>
    %283 = vector.broadcast %282 : vector<2x8x1xf32> to vector<2x8x8xf32>
    %284 = arith.mulf %279, %283 : vector<2x8x8xf32>
    %285 = arith.truncf %284 : vector<2x8x8xf32> to vector<2x8x8xbf16>
    %286 = arith.truncf %269 : vector<2x8x32xf32> to vector<2x8x32xbf16>
    "tpu.trace_start"() <{level = 10 : i32, message = "bqk,bkd->bqd"}> : () -> ()
    %cst_110 = arith.constant dense<0.000000e+00> : vector<2x8x32xf32>
    %287 = tpu.matmul %285, %286, %cst_110 {dimension_numbers = #tpu.dot_dimension_numbers<[2], [1], [1], [2], [0, 0, 0, 1, 1, 2], [0], [0]>} : vector<2x8x8xbf16>, vector<2x8x32xbf16>, vector<2x8x32xf32> -> vector<2x8x32xf32>
    "tpu.trace_stop"() : () -> ()
    %288 = vector.shape_cast %287 : vector<2x8x32xf32> to vector<16x32xf32>
    %c2_111 = arith.constant 2 : index
    %c0_112 = arith.constant 0 : index
    %c0_113 = arith.constant 0 : index
    %289 = vector.load %arg7[%c2_111, %c0_112, %c0_113] : memref<4x6x32xf32, #tpu.memory_space<vmem>>, vector<1x6x32xf32>
    %290 = vector.shape_cast %289 : vector<1x6x32xf32> to vector<6x32xf32>
    %291 = vector.extract_strided_slice %290 {offsets = [0, 0], sizes = [1, 32], strides = [1, 1]} : vector<6x32xf32> to vector<1x32xf32>
    %292 = vector.extract_strided_slice %290 {offsets = [1, 0], sizes = [1, 32], strides = [1, 1]} : vector<6x32xf32> to vector<1x32xf32>
    %293 = vector.extract_strided_slice %290 {offsets = [2, 0], sizes = [1, 32], strides = [1, 1]} : vector<6x32xf32> to vector<1x32xf32>
    %294 = vector.extract_strided_slice %290 {offsets = [3, 0], sizes = [1, 32], strides = [1, 1]} : vector<6x32xf32> to vector<1x32xf32>
    %295 = vector.extract_strided_slice %290 {offsets = [4, 0], sizes = [1, 32], strides = [1, 1]} : vector<6x32xf32> to vector<1x32xf32>
    %296 = vector.extract_strided_slice %290 {offsets = [5, 0], sizes = [1, 32], strides = [1, 1]} : vector<6x32xf32> to vector<1x32xf32>
    %297 = arith.truncf %288 : vector<16x32xf32> to vector<16x32xbf16>
    %c2_114 = arith.constant 2 : index
    %c0_115 = arith.constant 0 : index
    %c0_116 = arith.constant 0 : index
    %298 = vector.load %arg4[%c2_114, %c0_115, %c0_116] : memref<4x32x32xbf16, #tpu.memory_space<vmem>>, vector<1x32x32xbf16>
    %299 = vector.shape_cast %298 : vector<1x32x32xbf16> to vector<32x32xbf16>
    %cst_117 = arith.constant dense<0.000000e+00> : vector<16x32xf32>
    %300 = tpu.matmul %297, %299, %cst_117 {dimension_numbers = #tpu.dot_dimension_numbers<[1], [0], [0], [1], [0, 0, 1, 1], [], []>} : vector<16x32xbf16>, vector<32x32xbf16>, vector<16x32xf32> -> vector<16x32xf32>
    %301 = vector.broadcast %291 : vector<1x32xf32> to vector<16x32xf32>
    %302 = arith.addf %300, %301 : vector<16x32xf32>
    %303 = arith.addf %255, %302 : vector<16x32xf32>
    %cst_118 = arith.constant dense<0.000000e+00> : vector<16xf32>
    %304 = vector.multi_reduction <add>, %303, %cst_118 [1] : vector<16x32xf32> to vector<16xf32>
    %305 = vector.shape_cast %304 : vector<16xf32> to vector<16x1xf32>
    %cst_119 = arith.constant 3.200000e+01 : f32
    %306 = vector.broadcast %cst_119 : f32 to vector<16x1xf32>
    %307 = arith.divf %305, %306 : vector<16x1xf32>
    %308 = vector.broadcast %307 : vector<16x1xf32> to vector<16x32xf32>
    %309 = arith.subf %303, %308 : vector<16x32xf32>
    %310 = arith.mulf %309, %309 : vector<16x32xf32>
    %cst_120 = arith.constant dense<0.000000e+00> : vector<16xf32>
    %311 = vector.multi_reduction <add>, %310, %cst_120 [1] : vector<16x32xf32> to vector<16xf32>
    %312 = vector.shape_cast %311 : vector<16xf32> to vector<16x1xf32>
    %cst_121 = arith.constant 3.200000e+01 : f32
    %313 = vector.broadcast %cst_121 : f32 to vector<16x1xf32>
    %314 = arith.divf %312, %313 : vector<16x1xf32>
    %315 = vector.broadcast %307 : vector<16x1xf32> to vector<16x32xf32>
    %316 = arith.subf %303, %315 : vector<16x32xf32>
    %cst_122 = arith.constant 9.99999996E-13 : f32
    %317 = vector.broadcast %cst_122 : f32 to vector<16x1xf32>
    %318 = arith.addf %314, %317 : vector<16x1xf32>
    %319 = math.rsqrt %318 : vector<16x1xf32>
    %320 = vector.broadcast %319 : vector<16x1xf32> to vector<16x32xf32>
    %321 = arith.mulf %316, %320 : vector<16x32xf32>
    %322 = vector.broadcast %292 : vector<1x32xf32> to vector<16x32xf32>
    %323 = arith.mulf %321, %322 : vector<16x32xf32>
    %324 = vector.broadcast %293 : vector<1x32xf32> to vector<16x32xf32>
    %325 = arith.addf %323, %324 : vector<16x32xf32>
    %326 = arith.truncf %325 : vector<16x32xf32> to vector<16x32xbf16>
    %c2_123 = arith.constant 2 : index
    %c0_124 = arith.constant 0 : index
    %c0_125 = arith.constant 0 : index
    %327 = vector.load %arg5[%c2_123, %c0_124, %c0_125] : memref<4x32x64xbf16, #tpu.memory_space<vmem>>, vector<1x32x64xbf16>
    %328 = vector.shape_cast %327 : vector<1x32x64xbf16> to vector<32x64xbf16>
    %cst_126 = arith.constant dense<0.000000e+00> : vector<16x64xf32>
    %329 = tpu.matmul %326, %328, %cst_126 {dimension_numbers = #tpu.dot_dimension_numbers<[1], [0], [0], [1], [0, 0, 1, 1], [], []>} : vector<16x32xbf16>, vector<32x64xbf16>, vector<16x64xf32> -> vector<16x64xf32>
    %c2_127 = arith.constant 2 : index
    %c0_128 = arith.constant 0 : index
    %c0_129 = arith.constant 0 : index
    %330 = vector.load %arg8[%c2_127, %c0_128, %c0_129] : memref<4x1x64xf32, #tpu.memory_space<vmem>>, vector<1x1x64xf32>
    %331 = vector.shape_cast %330 : vector<1x1x64xf32> to vector<1x64xf32>
    %332 = vector.broadcast %331 : vector<1x64xf32> to vector<16x64xf32>
    %333 = arith.addf %329, %332 : vector<16x64xf32>
    %cst_130 = arith.constant 5.000000e-01 : f32
    %334 = vector.broadcast %cst_130 : f32 to vector<16x64xf32>
    %335 = arith.mulf %334, %333 : vector<16x64xf32>
    %cst_131 = arith.constant 4.471500e-02 : f32
    %336 = vector.broadcast %cst_131 : f32 to vector<16x64xf32>
    %337 = arith.mulf %336, %333 : vector<16x64xf32>
    %338 = arith.mulf %337, %333 : vector<16x64xf32>
    %339 = arith.mulf %338, %333 : vector<16x64xf32>
    %340 = arith.addf %333, %339 : vector<16x64xf32>
    %cst_132 = arith.constant 0.797884583 : f32
    %341 = vector.broadcast %cst_132 : f32 to vector<16x64xf32>
    %342 = arith.mulf %341, %340 : vector<16x64xf32>
    %343 = math.tanh %342 : vector<16x64xf32>
    %cst_133 = arith.constant 1.000000e+00 : f32
    %344 = vector.broadcast %cst_133 : f32 to vector<16x64xf32>
    %345 = arith.addf %344, %343 : vector<16x64xf32>
    %346 = arith.mulf %335, %345 : vector<16x64xf32>
    %347 = arith.truncf %346 : vector<16x64xf32> to vector<16x64xbf16>
    %c2_134 = arith.constant 2 : index
    %c0_135 = arith.constant 0 : index
    %c0_136 = arith.constant 0 : index
    %348 = vector.load %arg6[%c2_134, %c0_135, %c0_136] : memref<4x64x32xbf16, #tpu.memory_space<vmem>>, vector<1x64x32xbf16>
    %349 = vector.shape_cast %348 : vector<1x64x32xbf16> to vector<64x32xbf16>
    %cst_137 = arith.constant dense<0.000000e+00> : vector<16x32xf32>
    %350 = tpu.matmul %347, %349, %cst_137 {dimension_numbers = #tpu.dot_dimension_numbers<[1], [0], [0], [1], [0, 0, 1, 1], [], []>} : vector<16x64xbf16>, vector<64x32xbf16>, vector<16x32xf32> -> vector<16x32xf32>
    %351 = vector.broadcast %294 : vector<1x32xf32> to vector<16x32xf32>
    %352 = arith.addf %350, %351 : vector<16x32xf32>
    %353 = arith.addf %325, %352 : vector<16x32xf32>
    %cst_138 = arith.constant dense<0.000000e+00> : vector<16xf32>
    %354 = vector.multi_reduction <add>, %353, %cst_138 [1] : vector<16x32xf32> to vector<16xf32>
    %355 = vector.shape_cast %354 : vector<16xf32> to vector<16x1xf32>
    %cst_139 = arith.constant 3.200000e+01 : f32
    %356 = vector.broadcast %cst_139 : f32 to vector<16x1xf32>
    %357 = arith.divf %355, %356 : vector<16x1xf32>
    %358 = vector.broadcast %357 : vector<16x1xf32> to vector<16x32xf32>
    %359 = arith.subf %353, %358 : vector<16x32xf32>
    %360 = arith.mulf %359, %359 : vector<16x32xf32>
    %cst_140 = arith.constant dense<0.000000e+00> : vector<16xf32>
    %361 = vector.multi_reduction <add>, %360, %cst_140 [1] : vector<16x32xf32> to vector<16xf32>
    %362 = vector.shape_cast %361 : vector<16xf32> to vector<16x1xf32>
    %cst_141 = arith.constant 3.200000e+01 : f32
    %363 = vector.broadcast %cst_141 : f32 to vector<16x1xf32>
    %364 = arith.divf %362, %363 : vector<16x1xf32>
    %365 = vector.broadcast %357 : vector<16x1xf32> to vector<16x32xf32>
    %366 = arith.subf %353, %365 : vector<16x32xf32>
    %cst_142 = arith.constant 9.99999996E-13 : f32
    %367 = vector.broadcast %cst_142 : f32 to vector<16x1xf32>
    %368 = arith.addf %364, %367 : vector<16x1xf32>
    %369 = math.rsqrt %368 : vector<16x1xf32>
    %370 = vector.broadcast %369 : vector<16x1xf32> to vector<16x32xf32>
    %371 = arith.mulf %366, %370 : vector<16x32xf32>
    %372 = vector.broadcast %295 : vector<1x32xf32> to vector<16x32xf32>
    %373 = arith.mulf %371, %372 : vector<16x32xf32>
    %374 = vector.broadcast %296 : vector<1x32xf32> to vector<16x32xf32>
    %375 = arith.addf %373, %374 : vector<16x32xf32>
    %376 = vector.shape_cast %375 : vector<16x32xf32> to vector<2x8x32xf32>
    %c3 = arith.constant 3 : index
    %c0_143 = arith.constant 0 : index
    %c0_144 = arith.constant 0 : index
    %c0_145 = arith.constant 0 : index
    %377 = vector.load %arg11[%c3, %c0_143, %c0_144, %c0_145] : memref<5x2x8x32xf32, #tpu.memory_space<vmem>>, vector<1x2x8x32xf32>
    %378 = vector.shape_cast %377 : vector<1x2x8x32xf32> to vector<2x8x32xf32>
    %379 = vector.shape_cast %376 : vector<2x8x32xf32> to vector<1x2x8x32xf32>
    tpu.vector_store %arg11[%c3, %c0_143, %c0_144, %c0_145], %379 {strides = array<i32>} : memref<5x2x8x32xf32, #tpu.memory_space<vmem>>, vector<1x2x8x32xf32>,
    %380 = vector.shape_cast %376 : vector<2x8x32xf32> to vector<16x32xf32>
    %381 = arith.truncf %380 : vector<16x32xf32> to vector<16x32xbf16>
    %c3_146 = arith.constant 3 : index
    %c0_147 = arith.constant 0 : index
    %c0_148 = arith.constant 0 : index
    %382 = vector.load %arg2[%c3_146, %c0_147, %c0_148] : memref<4x32x384xbf16, #tpu.memory_space<vmem>>, vector<1x32x384xbf16>
    %383 = vector.shape_cast %382 : vector<1x32x384xbf16> to vector<32x384xbf16>
    %cst_149 = arith.constant dense<0.000000e+00> : vector<16x384xf32>
    %384 = tpu.matmul %381, %383, %cst_149 {dimension_numbers = #tpu.dot_dimension_numbers<[1], [0], [0], [1], [0, 0, 1, 1], [], []>} : vector<16x32xbf16>, vector<32x384xbf16>, vector<16x384xf32> -> vector<16x384xf32>
    %c3_150 = arith.constant 3 : index
    %c0_151 = arith.constant 0 : index
    %c0_152 = arith.constant 0 : index
    %385 = vector.load %arg3[%c3_150, %c0_151, %c0_152] : memref<4x1x384xf32, #tpu.memory_space<vmem>>, vector<1x1x384xf32>
    %386 = vector.shape_cast %385 : vector<1x1x384xf32> to vector<1x384xf32>
    %387 = vector.broadcast %386 : vector<1x384xf32> to vector<16x384xf32>
    %388 = arith.addf %384, %387 : vector<16x384xf32>
    %389 = vector.extract_strided_slice %388 {offsets = [0, 0], sizes = [16, 32], strides = [1, 1]} : vector<16x384xf32> to vector<16x32xf32>
    %390 = vector.shape_cast %389 : vector<16x32xf32> to vector<2x8x32xf32>
    %391 = vector.extract_strided_slice %388 {offsets = [0, 128], sizes = [16, 32], strides = [1, 1]} : vector<16x384xf32> to vector<16x32xf32>
    %392 = vector.shape_cast %391 : vector<16x32xf32> to vector<2x8x32xf32>
    %393 = vector.extract_strided_slice %388 {offsets = [0, 256], sizes = [16, 32], strides = [1, 1]} : vector<16x384xf32> to vector<16x32xf32>
    %394 = vector.shape_cast %393 : vector<16x32xf32> to vector<2x8x32xf32>
    %395 = arith.truncf %390 : vector<2x8x32xf32> to vector<2x8x32xbf16>
    %396 = arith.truncf %392 : vector<2x8x32xf32> to vector<2x8x32xbf16>
    "tpu.trace_start"() <{level = 10 : i32, message = "bqd,bkd->bqk"}> : () -> ()
    %cst_153 = arith.constant dense<0.000000e+00> : vector<2x8x8xf32>
    %397 = tpu.matmul %395, %396, %cst_153 {dimension_numbers = #tpu.dot_dimension_numbers<[2], [2], [1], [1], [0, 0, 0, 1, 1, 1], [0], [0]>} : vector<2x8x32xbf16>, vector<2x8x32xbf16>, vector<2x8x8xf32> -> vector<2x8x8xf32>
    "tpu.trace_stop"() : () -> ()
    %398 = vector.broadcast %4 : vector<2x1x8xf32> to vector<2x8x8xf32>
    %399 = arith.addf %397, %398 : vector<2x8x8xf32>
    %cst_154 = arith.constant dense<0xFF800000> : vector<2x8xf32>
    %400 = vector.multi_reduction <maximumf>, %399, %cst_154 [2] : vector<2x8x8xf32> to vector<2x8xf32>
    %401 = vector.shape_cast %400 : vector<2x8xf32> to vector<2x8x1xf32>
    %402 = vector.broadcast %401 : vector<2x8x1xf32> to vector<2x8x8xf32>
    %403 = arith.subf %399, %402 : vector<2x8x8xf32>
    %404 = math.exp %403 : vector<2x8x8xf32>
    %cst_155 = arith.constant dense<0.000000e+00> : vector<2x8xf32>
    %405 = vector.multi_reduction <add>, %404, %cst_155 [2] : vector<2x8x8xf32> to vector<2x8xf32>
    %406 = vector.shape_cast %405 : vector<2x8xf32> to vector<2x8x1xf32>
    %407 = tpu.reciprocal %406 {approx = true} : vector<2x8x1xf32> -> vector<2x8x1xf32>
    %408 = vector.broadcast %407 : vector<2x8x1xf32> to vector<2x8x8xf32>
    %409 = arith.mulf %404, %408 : vector<2x8x8xf32>
    %410 = arith.truncf %409 : vector<2x8x8xf32> to vector<2x8x8xbf16>
    %411 = arith.truncf %394 : vector<2x8x32xf32> to vector<2x8x32xbf16>
    "tpu.trace_start"() <{level = 10 : i32, message = "bqk,bkd->bqd"}> : () -> ()
    %cst_156 = arith.constant dense<0.000000e+00> : vector<2x8x32xf32>
    %412 = tpu.matmul %410, %411, %cst_156 {dimension_numbers = #tpu.dot_dimension_numbers<[2], [1], [1], [2], [0, 0, 0, 1, 1, 2], [0], [0]>} : vector<2x8x8xbf16>, vector<2x8x32xbf16>, vector<2x8x32xf32> -> vector<2x8x32xf32>
    "tpu.trace_stop"() : () -> ()
    %413 = vector.shape_cast %412 : vector<2x8x32xf32> to vector<16x32xf32>
    %c3_157 = arith.constant 3 : index
    %c0_158 = arith.constant 0 : index
    %c0_159 = arith.constant 0 : index
    %414 = vector.load %arg7[%c3_157, %c0_158, %c0_159] : memref<4x6x32xf32, #tpu.memory_space<vmem>>, vector<1x6x32xf32>
    %415 = vector.shape_cast %414 : vector<1x6x32xf32> to vector<6x32xf32>
    %416 = vector.extract_strided_slice %415 {offsets = [0, 0], sizes = [1, 32], strides = [1, 1]} : vector<6x32xf32> to vector<1x32xf32>
    %417 = vector.extract_strided_slice %415 {offsets = [1, 0], sizes = [1, 32], strides = [1, 1]} : vector<6x32xf32> to vector<1x32xf32>
    %418 = vector.extract_strided_slice %415 {offsets = [2, 0], sizes = [1, 32], strides = [1, 1]} : vector<6x32xf32> to vector<1x32xf32>
    %419 = vector.extract_strided_slice %415 {offsets = [3, 0], sizes = [1, 32], strides = [1, 1]} : vector<6x32xf32> to vector<1x32xf32>
    %420 = vector.extract_strided_slice %415 {offsets = [4, 0], sizes = [1, 32], strides = [1, 1]} : vector<6x32xf32> to vector<1x32xf32>
    %421 = vector.extract_strided_slice %415 {offsets = [5, 0], sizes = [1, 32], strides = [1, 1]} : vector<6x32xf32> to vector<1x32xf32>
    %422 = arith.truncf %413 : vector<16x32xf32> to vector<16x32xbf16>
    %c3_160 = arith.constant 3 : index
    %c0_161 = arith.constant 0 : index
    %c0_162 = arith.constant 0 : index
    %423 = vector.load %arg4[%c3_160, %c0_161, %c0_162] : memref<4x32x32xbf16, #tpu.memory_space<vmem>>, vector<1x32x32xbf16>
    %424 = vector.shape_cast %423 : vector<1x32x32xbf16> to vector<32x32xbf16>
    %cst_163 = arith.constant dense<0.000000e+00> : vector<16x32xf32>
    %425 = tpu.matmul %422, %424, %cst_163 {dimension_numbers = #tpu.dot_dimension_numbers<[1], [0], [0], [1], [0, 0, 1, 1], [], []>} : vector<16x32xbf16>, vector<32x32xbf16>, vector<16x32xf32> -> vector<16x32xf32>
    %426 = vector.broadcast %416 : vector<1x32xf32> to vector<16x32xf32>
    %427 = arith.addf %425, %426 : vector<16x32xf32>
    %428 = arith.addf %380, %427 : vector<16x32xf32>
    %cst_164 = arith.constant dense<0.000000e+00> : vector<16xf32>
    %429 = vector.multi_reduction <add>, %428, %cst_164 [1] : vector<16x32xf32> to vector<16xf32>
    %430 = vector.shape_cast %429 : vector<16xf32> to vector<16x1xf32>
    %cst_165 = arith.constant 3.200000e+01 : f32
    %431 = vector.broadcast %cst_165 : f32 to vector<16x1xf32>
    %432 = arith.divf %430, %431 : vector<16x1xf32>
    %433 = vector.broadcast %432 : vector<16x1xf32> to vector<16x32xf32>
    %434 = arith.subf %428, %433 : vector<16x32xf32>
    %435 = arith.mulf %434, %434 : vector<16x32xf32>
    %cst_166 = arith.constant dense<0.000000e+00> : vector<16xf32>
    %436 = vector.multi_reduction <add>, %435, %cst_166 [1] : vector<16x32xf32> to vector<16xf32>
    %437 = vector.shape_cast %436 : vector<16xf32> to vector<16x1xf32>
    %cst_167 = arith.constant 3.200000e+01 : f32
    %438 = vector.broadcast %cst_167 : f32 to vector<16x1xf32>
    %439 = arith.divf %437, %438 : vector<16x1xf32>
    %440 = vector.broadcast %432 : vector<16x1xf32> to vector<16x32xf32>
    %441 = arith.subf %428, %440 : vector<16x32xf32>
    %cst_168 = arith.constant 9.99999996E-13 : f32
    %442 = vector.broadcast %cst_168 : f32 to vector<16x1xf32>
    %443 = arith.addf %439, %442 : vector<16x1xf32>
    %444 = math.rsqrt %443 : vector<16x1xf32>
    %445 = vector.broadcast %444 : vector<16x1xf32> to vector<16x32xf32>
    %446 = arith.mulf %441, %445 : vector<16x32xf32>
    %447 = vector.broadcast %417 : vector<1x32xf32> to vector<16x32xf32>
    %448 = arith.mulf %446, %447 : vector<16x32xf32>
    %449 = vector.broadcast %418 : vector<1x32xf32> to vector<16x32xf32>
    %450 = arith.addf %448, %449 : vector<16x32xf32>
    %451 = arith.truncf %450 : vector<16x32xf32> to vector<16x32xbf16>
    %c3_169 = arith.constant 3 : index
    %c0_170 = arith.constant 0 : index
    %c0_171 = arith.constant 0 : index
    %452 = vector.load %arg5[%c3_169, %c0_170, %c0_171] : memref<4x32x64xbf16, #tpu.memory_space<vmem>>, vector<1x32x64xbf16>
    %453 = vector.shape_cast %452 : vector<1x32x64xbf16> to vector<32x64xbf16>
    %cst_172 = arith.constant dense<0.000000e+00> : vector<16x64xf32>
    %454 = tpu.matmul %451, %453, %cst_172 {dimension_numbers = #tpu.dot_dimension_numbers<[1], [0], [0], [1], [0, 0, 1, 1], [], []>} : vector<16x32xbf16>, vector<32x64xbf16>, vector<16x64xf32> -> vector<16x64xf32>
    %c3_173 = arith.constant 3 : index
    %c0_174 = arith.constant 0 : index
    %c0_175 = arith.constant 0 : index
    %455 = vector.load %arg8[%c3_173, %c0_174, %c0_175] : memref<4x1x64xf32, #tpu.memory_space<vmem>>, vector<1x1x64xf32>
    %456 = vector.shape_cast %455 : vector<1x1x64xf32> to vector<1x64xf32>
    %457 = vector.broadcast %456 : vector<1x64xf32> to vector<16x64xf32>
    %458 = arith.addf %454, %457 : vector<16x64xf32>
    %cst_176 = arith.constant 5.000000e-01 : f32
    %459 = vector.broadcast %cst_176 : f32 to vector<16x64xf32>
    %460 = arith.mulf %459, %458 : vector<16x64xf32>
    %cst_177 = arith.constant 4.471500e-02 : f32
    %461 = vector.broadcast %cst_177 : f32 to vector<16x64xf32>
    %462 = arith.mulf %461, %458 : vector<16x64xf32>
    %463 = arith.mulf %462, %458 : vector<16x64xf32>
    %464 = arith.mulf %463, %458 : vector<16x64xf32>
    %465 = arith.addf %458, %464 : vector<16x64xf32>
    %cst_178 = arith.constant 0.797884583 : f32
    %466 = vector.broadcast %cst_178 : f32 to vector<16x64xf32>
    %467 = arith.mulf %466, %465 : vector<16x64xf32>
    %468 = math.tanh %467 : vector<16x64xf32>
    %cst_179 = arith.constant 1.000000e+00 : f32
    %469 = vector.broadcast %cst_179 : f32 to vector<16x64xf32>
    %470 = arith.addf %469, %468 : vector<16x64xf32>
    %471 = arith.mulf %460, %470 : vector<16x64xf32>
    %472 = arith.truncf %471 : vector<16x64xf32> to vector<16x64xbf16>
    %c3_180 = arith.constant 3 : index
    %c0_181 = arith.constant 0 : index
    %c0_182 = arith.constant 0 : index
    %473 = vector.load %arg6[%c3_180, %c0_181, %c0_182] : memref<4x64x32xbf16, #tpu.memory_space<vmem>>, vector<1x64x32xbf16>
    %474 = vector.shape_cast %473 : vector<1x64x32xbf16> to vector<64x32xbf16>
    %cst_183 = arith.constant dense<0.000000e+00> : vector<16x32xf32>
    %475 = tpu.matmul %472, %474, %cst_183 {dimension_numbers = #tpu.dot_dimension_numbers<[1], [0], [0], [1], [0, 0, 1, 1], [], []>} : vector<16x64xbf16>, vector<64x32xbf16>, vector<16x32xf32> -> vector<16x32xf32>
    %476 = vector.broadcast %419 : vector<1x32xf32> to vector<16x32xf32>
    %477 = arith.addf %475, %476 : vector<16x32xf32>
    %478 = arith.addf %450, %477 : vector<16x32xf32>
    %cst_184 = arith.constant dense<0.000000e+00> : vector<16xf32>
    %479 = vector.multi_reduction <add>, %478, %cst_184 [1] : vector<16x32xf32> to vector<16xf32>
    %480 = vector.shape_cast %479 : vector<16xf32> to vector<16x1xf32>
    %cst_185 = arith.constant 3.200000e+01 : f32
    %481 = vector.broadcast %cst_185 : f32 to vector<16x1xf32>
    %482 = arith.divf %480, %481 : vector<16x1xf32>
    %483 = vector.broadcast %482 : vector<16x1xf32> to vector<16x32xf32>
    %484 = arith.subf %478, %483 : vector<16x32xf32>
    %485 = arith.mulf %484, %484 : vector<16x32xf32>
    %cst_186 = arith.constant dense<0.000000e+00> : vector<16xf32>
    %486 = vector.multi_reduction <add>, %485, %cst_186 [1] : vector<16x32xf32> to vector<16xf32>
    %487 = vector.shape_cast %486 : vector<16xf32> to vector<16x1xf32>
    %cst_187 = arith.constant 3.200000e+01 : f32
    %488 = vector.broadcast %cst_187 : f32 to vector<16x1xf32>
    %489 = arith.divf %487, %488 : vector<16x1xf32>
    %490 = vector.broadcast %482 : vector<16x1xf32> to vector<16x32xf32>
    %491 = arith.subf %478, %490 : vector<16x32xf32>
    %cst_188 = arith.constant 9.99999996E-13 : f32
    %492 = vector.broadcast %cst_188 : f32 to vector<16x1xf32>
    %493 = arith.addf %489, %492 : vector<16x1xf32>
    %494 = math.rsqrt %493 : vector<16x1xf32>
    %495 = vector.broadcast %494 : vector<16x1xf32> to vector<16x32xf32>
    %496 = arith.mulf %491, %495 : vector<16x32xf32>
    %497 = vector.broadcast %420 : vector<1x32xf32> to vector<16x32xf32>
    %498 = arith.mulf %496, %497 : vector<16x32xf32>
    %499 = vector.broadcast %421 : vector<1x32xf32> to vector<16x32xf32>
    %500 = arith.addf %498, %499 : vector<16x32xf32>
    %501 = vector.shape_cast %500 : vector<16x32xf32> to vector<2x8x32xf32>
    %c4 = arith.constant 4 : index
    %c0_189 = arith.constant 0 : index
    %c0_190 = arith.constant 0 : index
    %c0_191 = arith.constant 0 : index
    %502 = vector.load %arg11[%c4, %c0_189, %c0_190, %c0_191] : memref<5x2x8x32xf32, #tpu.memory_space<vmem>>, vector<1x2x8x32xf32>
    %503 = vector.shape_cast %502 : vector<1x2x8x32xf32> to vector<2x8x32xf32>
    %504 = vector.shape_cast %501 : vector<2x8x32xf32> to vector<1x2x8x32xf32>
    tpu.vector_store %arg11[%c4, %c0_189, %c0_190, %c0_191], %504 {strides = array<i32>} : memref<5x2x8x32xf32, #tpu.memory_space<vmem>>, vector<1x2x8x32xf32>,
    %505 = vector.extract_strided_slice %126 {offsets = [0, 0, 0], sizes = [2, 1, 32], strides = [1, 1, 1]} : vector<2x8x32xf32> to vector<2x1x32xf32>
    %506 = vector.shape_cast %505 : vector<2x1x32xf32> to vector<2x32xf32>
    %507 = vector.extract_strided_slice %251 {offsets = [0, 0, 0], sizes = [2, 1, 32], strides = [1, 1, 1]} : vector<2x8x32xf32> to vector<2x1x32xf32>
    %508 = vector.shape_cast %507 : vector<2x1x32xf32> to vector<2x32xf32>
    %509 = vector.extract_strided_slice %376 {offsets = [0, 0, 0], sizes = [2, 1, 32], strides = [1, 1, 1]} : vector<2x8x32xf32> to vector<2x1x32xf32>
    %510 = vector.shape_cast %509 : vector<2x1x32xf32> to vector<2x32xf32>
    %511 = vector.extract_strided_slice %501 {offsets = [0, 0, 0], sizes = [2, 1, 32], strides = [1, 1, 1]} : vector<2x8x32xf32> to vector<2x1x32xf32>
    %512 = vector.shape_cast %511 : vector<2x1x32xf32> to vector<2x32xf32>
    %513 = arith.addf %506, %508 : vector<2x32xf32>
    %514 = arith.addf %513, %510 : vector<2x32xf32>
    %515 = arith.addf %514, %512 : vector<2x32xf32>
    %cst_192 = arith.constant 2.500000e-01 : f32
    %516 = vector.broadcast %cst_192 : f32 to vector<2x32xf32>
    %517 = arith.mulf %515, %516 : vector<2x32xf32>
    %518 = arith.truncf %517 : vector<2x32xf32> to vector<2x32xbf16>
    %c0_193 = arith.constant 0 : index
    %c0_194 = arith.constant 0 : index
    %519 = vector.load %arg9[%c0_193, %c0_194] : memref<32x128xbf16, #tpu.memory_space<vmem>>, vector<32x128xbf16>
    %cst_195 = arith.constant dense<0.000000e+00> : vector<2x128xf32>
    %520 = tpu.matmul %518, %519, %cst_195 {dimension_numbers = #tpu.dot_dimension_numbers<[1], [0], [0], [1], [0, 0, 1, 1], [], []>} : vector<2x32xbf16>, vector<32x128xbf16>, vector<2x128xf32> -> vector<2x128xf32>
    %c0_196 = arith.constant 0 : index
    %c0_197 = arith.constant 0 : index
    %521 = vector.load %arg10[%c0_196, %c0_197] : memref<1x128xf32, #tpu.memory_space<vmem>>, vector<1x128xf32>
    %522 = vector.broadcast %521 : vector<1x128xf32> to vector<2x128xf32>
    %523 = arith.addf %520, %522 : vector<2x128xf32>
    %c0_198 = arith.constant 0 : index
    %c0_199 = arith.constant 0 : index
    %524 = vector.load %arg12[%c0_198, %c0_199] : memref<2x128xf32, #tpu.memory_space<vmem>>, vector<2x128xf32>
    tpu.vector_store %arg12[%c0_198, %c0_199], %523 {strides = array<i32>} : memref<2x128xf32, #tpu.memory_space<vmem>>, vector<2x128xf32>,
    return
  }
}

</mosaic_0001>

<bundles_post_ra>
// kernel: tpu_custom_call.1
= control target key start
LH: loop header
LB: loop body
LE: loop exit
PB: predicated region body
PF: predicated region fallthrough
CT: control target
= control target key end

     0   :  { %18 = vsyncpa [#allocation3], 0  ;;  %s4447_s0 = inlined_call_operand.hbm [shape: f32[2,8,32], index: 0, kind: input, shape index: {}]   ;;  %s4448_s1 = inlined_call_operand.vmem [shape: f32[2,1,8], index: 1, kind: input, shape index: {}]   ;;  %s4449_s2 = inlined_call_operand.vmem [shape: bf16[4,32,384], index: 2, kind: input, shape index: {}]   ;;  %s4450_s3 = inlined_call_operand.hbm [shape: f32[4,1,384], index: 3, kind: input, shape index: {}]   ;;  %s4451_s4 = inlined_call_operand.hbm [shape: bf16[4,32,32], index: 4, kind: input, shape index: {}]   ;;  %s4452_s5 = inlined_call_operand.hbm [shape: bf16[4,32,64], index: 5, kind: input, shape index: {}]   ;;  %s4453_s6 = inlined_call_operand.vmem [shape: bf16[4,64,32], index: 6, kind: input, shape index: {}]   ;;  %s4454_s7 = inlined_call_operand.vmem [shape: f32[4,6,32], index: 7, kind: input, shape index: {}]   ;;  %s4455_s8 = inlined_call_operand.vmem [shape: f32[4,1,64], index: 8, kind: input, shape index: {}]   ;;  %s4456_s9 = inlined_call_operand.hbm [shape: bf16[32,128], index: 9, kind: input, shape index: {}]   ;;  %s4457_s10 = inlined_call_operand.vmem [shape: f32[1,128], index: 10, kind: input, shape index: {}]   ;;  %s4458_s11 = inlined_call_operand.hbm [shape: f32[5,2,8,32], index: 11, kind: output, shape index: {0}]   ;;  %s4459_s12 = inlined_call_operand.hbm [shape: f32[2,128], index: 12, kind: output, shape index: {1}]  }
   0x1   :  { %19 = vsyncpa [#allocation6], 0 }
   0x2   :  { %20 = vsyncpa [#allocation9], 0 }
   0x3   :  { %21 = vsyncpa [#allocation4], 0 }
   0x4   :  { %22 = vsyncpa [#allocation13], 0  ;;  %s3782_s21 = smov [#allocation5]  }
   0x5   :  { %s44_s22 = sshll.u32 %s3782_s21, 4  ;;  %s45_s22 = int_to_ptr.vmem [resolvable:$true] %s44_s22 }
   0x6   :  { %s3640_s23 = scalar_lea.vmem %s45_s22, 192  ;;  %p3645_p1 = scmp.lt.s32.totalorder %s45_s22, %s45_s22 }
   0x7   :  { %p3641_p0 = scmp.ne.s32.totalorder %s45_s22, %s3640_s23  ;;  %p3646_p2 = scmp.lt.s32.totalorder %s3640_s23, %s3640_s23 }
   0x9   :  { %p3647_p3 = por %p3646_p2, %p3645_p1 }
   0xb   :  { %p3648_p4 = pnand %p3647_p3, %p3641_p0 }
   0xd   :  { %3651 = shalt.err (!%p3648_p4)
}
   0xe   :  { %s3783_s24 = smov 48   ;;  %s3784_s25 = smov 3  }
   0xf   :  { %50 = dma.hbm_to_vmem [thread:$0]  %s4450_s3, 192, %s45_s22, [#allocation6], %s3783_s24, %s3783_s24, %s3784_s25  }
  0x10   :  { %s3785_s28 = smov [#allocation8]   ;;  %s3786_s30 = smov [#allocation2]  }
  0x11   :  { %s68_s29 = sshll.u32 %s3785_s28, 4  ;;  %s28_s13 = sshll.u32 %s3786_s30, 4  ;;  %s69_s29 = int_to_ptr.vmem [resolvable:$true] %s68_s29  ;;  %s29_s13 = int_to_ptr.vmem [resolvable:$true] %s28_s13 }
  0x12   :  { %s3660_s14 = scalar_lea.vmem %s69_s29, 1024  ;;  %p3665_p6 = scmp.lt.s32.totalorder %s69_s29, %s69_s29 }
  0x13   :  { %p3661_p5 = scmp.ne.s32.totalorder %s69_s29, %s3660_s14  ;;  %p3666_p7 = scmp.lt.s32.totalorder %s3660_s14, %s3660_s14 }
  0x15   :  { %p3667_p8 = por %p3666_p7, %p3665_p6 }
  0x17   :  { %p3668_p9 = pnand %p3667_p8, %p3661_p5 }
  0x19   :  { %3671 = shalt.err (!%p3668_p9)
}
  0x1a   :  { %s3787_s15 = smov 64   ;;  %s3788_s16 = smov 4  }
  0x1b   :  { %74 = dma.hbm_to_vmem [thread:$0]  %s4452_s5, 1024, %s69_s29, [#allocation9], %s3787_s15, %s3787_s15, %s3788_s16  }
  0x1c   :  { %s3680_s3 = scalar_lea.vmem %s29_s13, 256  ;;  %p3685_p11 = scmp.lt.s32.totalorder %s29_s13, %s29_s13 }
  0x1d   :  { %p3681_p10 = scmp.ne.s32.totalorder %s29_s13, %s3680_s3  ;;  %p3686_p12 = scmp.lt.s32.totalorder %s3680_s3, %s3680_s3 }
  0x1f   :  { %p3687_p13 = por %p3686_p12, %p3685_p11 }
  0x21   :  { %p3688_p0 = pnand %p3687_p13, %p3681_p10 }
  0x23   :  { %3691 = shalt.err (!%p3688_p0)
}
  0x24   :  { %s3789_s19 = smov 128   ;;  %s3790_s20 = smov 8  }
  0x25   :  { %34 = dma.hbm_to_vmem [thread:$0]  %s4447_s0, 256, %s29_s13, [#allocation3], %s3789_s19, %s3789_s19, %s3790_s20  }
  0x26   :  { %s3791_s23 = smov [#allocation7]   ;;  %s3792_s5 = smov [#allocation10]  }
  0x27   :  { %s56_s24 = sshll.u32 %s3791_s23, 4  ;;  %s86_s25 = sshll.u32 %s3792_s5, 4  ;;  %s57_s24 = int_to_ptr.vmem [resolvable:$true] %s56_s24  ;;  %s87_s25 = int_to_ptr.vmem [resolvable:$true] %s86_s25 }
  0x28   :  { %s3700_s26 = scalar_lea.vmem %s57_s24, 1024  ;;  %p3705_p2 = scmp.lt.s32.totalorder %s57_s24, %s57_s24 }
  0x29   :  { %p3701_p1 = scmp.ne.s32.totalorder %s57_s24, %s3700_s26  ;;  %p3706_p3 = scmp.lt.s32.totalorder %s3700_s26, %s3700_s26 }
  0x2b   :  { %p3707_p4 = por %p3706_p3, %p3705_p2 }
  0x2d   :  { %p3708_p5 = pnand %p3707_p4, %p3701_p1 }
  0x2f   :  { %3711 = shalt.err (!%p3708_p5)
}
  0x30   :  { %62 = dma.hbm_to_vmem [thread:$0]  %s4451_s4, 1024, %s57_s24, [#allocation6], %s3787_s15, %s3787_s15, %s3788_s16  }
  0x31   :  { %s3720_s0 = scalar_lea.vmem %s87_s25, 256  ;;  %p3725_p7 = scmp.lt.s32.totalorder %s87_s25, %s87_s25 }
  0x32   :  { %p3721_p6 = scmp.ne.s32.totalorder %s87_s25, %s3720_s0  ;;  %p3726_p8 = scmp.lt.s32.totalorder %s3720_s0, %s3720_s0 }
  0x34   :  { %p3727_p9 = por %p3726_p8, %p3725_p7 }
  0x36   :  { %p3728_p10 = pnand %p3727_p9, %p3721_p6 }
  0x38   :  { %3731 = shalt.err (!%p3728_p10)
}
  0x39   :  { %92 = dma.hbm_to_vmem [thread:$0]  %s4456_s9, 256, %s87_s25, [#allocation9], %s3787_s15, %s3787_s15, %s3788_s16  }
  0x3a   :  { %3772 = dma.done.wait [#allocation3], 256  }
  0x3b   :  { %3773 = vsyncadd [#allocation3], 4294967040 }
  0x3c   :  { %3774 = dma.done.wait [#allocation6], 1216  }
  0x3d   :  { %3775 = vsyncadd [#allocation6], 4294966080 }
  0x3e   :  { %3776 = dma.done.wait [#allocation9], 1280  }
  0x3f   :  { %3777 = vsyncadd [#allocation9], 4294966016  ;;  %v3793_v0 = vmov 0   ;;  %v3794_v1 = vmov 0.0   ;;  %v3484_v2 = vld [vmem:[%s4449_s2 + $0x1c] ss:$12 sps:$4 sm:$0xff]   ;;  %v129_v11 = vlaneseq }
  0x40   :  { %211 = vmatprep.mubr.bf16.mxu0 %v3793_v0  ;;  %3220 = vmatprep.subr.bf16.mxu1 %v3794_v1  ;;  %v3486_v3 = vld [vmem:[%s4449_s2 + $0x18] ss:$12 sps:$4 sm:$0xff]   ;;  %v3489_v5 = vld [vmem:[%s4449_s2] ss:$12 sps:$4 sm:$0xff]   ;;  %vm113_vm0 = vcmask 261120   ;;  %vm3795_vm1 = vmmov 0  }
  0x41   :  { %191 = vmatprep.subr.bf16.mxu0 %v3484_v2  ;;  %v3487_v4 = vld [vmem:[%s4449_s2 + $0x4] ss:$12 sps:$4 sm:$0xff]   ;;  %v3906_v7 = vld [vmem:[#allocation2 + $0x8] sm:$0xff]  ;;  %3224 = vmatprep.mubr.msk.bf16.mxu1 %vm3795_vm1, %v3794_v1  ;;  %v3931_v12 = vshrl.u32 %v129_v11, 7  ;;  %vm401_vm2 = vcmask 1043456   ;;  %vm371_vm3 = vcmask 64512  }
  0x42   :  { %v3904_v6 = vld [vmem:[#allocation2] sm:$0xff]  ;;  %192 = vmatpush1.bf16.msra.mxu0 %v3486_v3  ;;  %115 = vst.msk [vmem:[#allocation11 + $0x8] sm:$0xff] %vm113_vm0, %v3906_v7  ;;  %v3491_v10 = vld [vmem:[%s4449_s2 + $0x8] ss:$12 sps:$4 sm:$0xff]   ;;  %v127_v14 = vld [vmem:[#allocation5] sm:$0x7] }
  0x43   :  { %114 = vst.msk [vmem:[#allocation11] sm:$0xff] %vm113_vm0, %v3904_v6  ;;  %193 = vmatprep.subr.bf16.mxu0 %v3487_v4  ;;  %v3490_v8 = vld [vmem:[%s4449_s2 + $0x20] ss:$12 sps:$4 sm:$0xff]   ;;  %v118_v9 = vpack.c.bf16 %v3906_v7, %v3904_v6  ;;  %v3934_v13 = vsub.s32 1, %v3931_v12  ;;  %v3938_v17 = vsub.s32 0, %v3931_v12  ;;  %v3952_v32 = vsub.s32 2, %v3931_v12 }
  0x44   :  { %3221 = vmatpush3.bf16.msra.mxu1 %v3490_v8  ;;  %v3962_v44 = vld [vmem:[%s4448_s1] ss:$0 sm:$0xff]  ;;  %v3968_v48 = vld [vmem:[%s4448_s1 + $0x1] ss:$0 sm:$0xff]  ;;  %vm721_vm4 = vcmask 523264   ;;  %vm2881_vm5 = vcmask 1041409  }
  0x45   :  { %3222 = vmatprep.subr.bf16.mxu1 %v3794_v1  ;;  %v136_v15 = vrot.slane %v127_v14, %v3934_v13  ;;  %v132_v21 = vrot.slane %v127_v14, %v3938_v17  ;;  %v140_v33 = vrot.slane %v127_v14, %v3952_v32 }
  0x46   :  { %194 = vmatpush1.bf16.msra.mxu0 %v3489_v5 }
  0x47   :  { %3228 = vmatprep.subr.bf16.mxu0 %v3794_v1 }
  0x48   :  { %3223 = vmatpush3.bf16.msra.mxu1 %v3491_v10 }
  0x49   :  { %2979 = vmatmul.mubr.msk.bf16.vlgmr.msra.gmra.mxu0 %vm113_vm0, %v118_v9  ;;  %3234 = vmatprep.subr.bf16.mxu1 %v3794_v1 }
  0x4a   :  { %3230 = vmatprep.mubr.msk.bf16.mxu0 %vm3795_vm1, %v3794_v1 }
  0x4b   :  { %3225 = vmatmul.mubr.msk.bf16.vlgmr.msra.gmra.mxu1 %vm113_vm0, %v118_v9 }
  0x4c   :  { %3236 = vmatprep.mubr.msk.bf16.mxu1 %vm3795_vm1, %v3794_v1 }
 0x109   :  { %v213_v16 = vpop.f32.mrf.mxu0 }
 0x10a   :  { %v214_v26 = vadd.f32 %v213_v16, %v132_v21 }
 0x10b   :  { %v215_v18 = vpop.f32.mrf.mxu0  ;;  %v256_v34 = vpop.f32.mrf.mxu1 }
 0x10c   :  { %v216_v19 = vadd.f32 %v215_v18, %v136_v15  ;;  %v263_v29 = vpack.c.bf16 %v214_v26, %v214_v26  ;;  %v257_v35 = vadd.f32 %v256_v34, %v140_v33 }
 0x10d   :  { %v217_v20 = vpop.f32.mrf.mxu0  ;;  %v3226_v36 = vpop.f32.mrf.mxu1 }
 0x10e   :  { %v265_v22 = vpack.c.bf16 %v216_v19, %v216_v19  ;;  %v218_v30 = vadd.f32 %v217_v20, %v132_v21  ;;  %v396_v37 = vpack.c.bf16 %v257_v35, %v257_v35  ;;  %v3492_v19 = vld [vmem:[#allocation7 + $0x8] sm:$0xff]   ;;  %v3493_v20 = vld [vmem:[#allocation7] sm:$0xff]  }
 0x10f   :  { %v219_v23 = vpop.f32.mrf.mxu0  ;;  %v259_v38 = vpop.f32.mrf.mxu1 }
 0x110   :  { %v283_v24 = vsel %vm113_vm0, %v265_v22, 0  ;;  %v220_v25 = vadd.f32 %v219_v23, %v136_v15  ;;  %v264_v31 = vpack.c.bf16 %v218_v30, %v218_v30  ;;  %v403_v39 = vsel %vm401_vm2, %v396_v37, 0  ;;  %v3989_v30 = vld [vmem:[%s4454_s7] sm:$0x3f] }
 0x111   :  { %3229 = vmatpush3.bf16.xpose.msra.mxu0 %v283_v24  ;;  %v260_v40 = vadd.f32 %v259_v38, %v140_v33  ;;  %v3227_v41 = vpop.f32.mrf.mxu1 }
 0x112   :  { %v266_v27 = vpack.c.bf16 %v220_v25, %v220_v25  ;;  %3240 = vmatprep.subr.bf16.mxu0 %v3794_v1 }
 0x113   :  { %v397_v42 = vpack.c.bf16 %v260_v40, %v260_v40 }
 0x114   :  { %v329_v28 = vsel %vm113_vm0, %v266_v27, 0 }
 0x115   :  { %3235 = vmatpush3.bf16.xpose.msra.mxu1 %v329_v28  ;;  %v449_v43 = vsel %vm401_vm2, %v397_v42, 0 }
 0x116   :  { %3246 = vmatprep.subr.bf16.mxu1 %v3794_v1 }
 0x118   :  { %3231 = vmatmul.mubr.msk.bf16.vlgmr.msra.gmra.mxu0 %vm113_vm0, %v263_v29 }
 0x119   :  { %3242 = vmatprep.mubr.msk.bf16.mxu0 %vm3795_vm1, %v3794_v1  ;;  %3241 = vmatpush3.bf16.msra.mxu0 %v403_v39 }
 0x11a   :  { %3252 = vmatprep.subr.bf16.mxu0 %v3794_v1 }
 0x11c   :  { %3237 = vmatmul.mubr.msk.bf16.vlgmr.msra.gmra.mxu1 %vm113_vm0, %v264_v31  ;;  %v500_v31 = vrot.slane %v3989_v30, %v3938_v17 }
 0x11d   :  { %3248 = vmatprep.mubr.msk.bf16.mxu1 %vm3795_vm1, %v3794_v1  ;;  %3247 = vmatpush3.bf16.msra.mxu1 %v449_v43 }
 0x11e   :  { %3260 = vmatprep.subr.bf16.mxu1 %v3794_v1 }
 0x1d8   :  { %v319_v45 = vpop.f32.mrf.mxu0 }
 0x1d9   :  { %v320_v46 = vadd.f32 %v3962_v44, %v319_v45 }
 0x1da   :  { %v3232_v47 = vpop.f32.mrf.mxu0 }
 0x1db   :  { %v372_v49 = vsel %vm371_vm3, %v320_v46, -inf }
 0x1dc   :  { %v365_v50 = vpop.f32.mrf.mxu1  ;;  %373 = vmax.xlane.f32.xlu0 %v372_v49  ;;  %v322_v51 = vpop.f32.mrf.mxu0 }
 0x1dd   :  { %v366_v52 = vadd.f32 %v3968_v48, %v365_v50 }
 0x1de   :  { %v3233_v53 = vpop.f32.mrf.mxu0  ;;  %v3238_v54 = vpop.f32.mrf.mxu1 }
 0x1df   :  { %v375_v55 = vsel %vm371_vm3, %v366_v52, -inf  ;;  %v3494_v54 = vld [vmem:[#allocation8 + $0x8] sm:$0xff]  }
 0x1e0   :  { %v368_v56 = vpop.f32.mrf.mxu1  ;;  %376 = vmax.xlane.f32.xlu0 %v375_v55 }
 0x1e2   :  { %v3239_v57 = vpop.f32.mrf.mxu1 }
 0x265   :  { %v374_v58 = vpop.xlane.xlu0 %373 }
 0x266   :  { %v378_v59 = vsub.f32 %v320_v46, %v374_v58 }
 0x268   :  { %v380_v60 = vmul.f32 1.442695, %v378_v59 }
 0x269   :  { %v377_v61 = vpop.xlane.xlu0 %376 }
 0x26a   :  { %3550 = vpow2.f32 %v380_v60  ;;  %v379_v62 = vsub.f32 %v366_v52, %v377_v61 }
 0x26c   :  { %v382_v63 = vmul.f32 1.442695, %v379_v62 }
 0x26e   :  { %3552 = vpow2.f32 %v382_v63  ;;  %v589_v63 = vrot.slane %v3989_v30, %v3934_v13 }
 0x277   :  { %v3551_v2 = vpop.eup %3550 }
 0x278   :  { %v384_v3 = vsel %vm371_vm3, %v3551_v2, 0.0 }
 0x279   :  { %385 = vadd.xlane.f32.xlu1 %v384_v3 }
 0x27b   :  { %v3553_v4 = vpop.eup %3552 }
 0x27c   :  { %v387_v5 = vsel %vm371_vm3, %v3553_v4, 0.0 }
 0x27d   :  { %388 = vadd.xlane.f32.xlu1 %v387_v5  ;;  %v595_v5 = vrot.slane %v3989_v30, %v3952_v32 }
 0x302   :  { %v386_v8 = vpop.xlane.xlu1 %385 }
 0x303   :  { %3554 = vrcp.f32 %v386_v8 }
 0x306   :  { %v389_v9 = vpop.xlane.xlu1 %388 }
 0x307   :  { %3556 = vrcp.f32 %v389_v9 }
 0x310   :  { %v3555_v10 = vpop.eup %3554 }
 0x311   :  { %v392_v11 = vmul.f32 %v3555_v10, %v3551_v2 }
 0x313   :  { %v394_v14 = vpack.c.bf16 %v392_v11, %v392_v11 }
 0x314   :  { %v3557_v15 = vpop.eup %3556 }
 0x315   :  { %3243 = vmatmul.mubr.msk.bf16.vlgmr.msra.gmra.mxu0 %vm371_vm3, %v394_v14  ;;  %v393_v16 = vmul.f32 %v3557_v15, %v3553_v4  ;;  %v3496_v14 = vld [vmem:[%s4453_s6 + $0x18] sm:$0xff]   ;;  %v3497_v15 = vld [vmem:[%s4453_s6 + $0x10] sm:$0xff]  }
 0x316   :  { %3256 = vmatprep.mubr.msk.bf16.mxu0 %vm3795_vm1, %v3794_v1  ;;  %3253 = vmatpush3.bf16.msra.mxu0 %v3492_v19  ;;  %v2990_v19 = vld [vmem:[%s4455_s8] ss:$0 sm:$0xff] }
 0x317   :  { %v395_v18 = vpack.c.bf16 %v393_v16, %v393_v16  ;;  %3254 = vmatprep.subr.bf16.mxu0 %v3794_v1  ;;  %v3498_v16 = vld [vmem:[%s4453_s6 + $0x8] sm:$0xff]  }
 0x319   :  { %3249 = vmatmul.mubr.msk.bf16.vlgmr.msra.gmra.mxu1 %vm371_vm3, %v395_v18  ;;  %v3499_v18 = vld [vmem:[%s4453_s6] sm:$0xff]  }
 0x31a   :  { %3264 = vmatprep.mubr.msk.bf16.mxu1 %vm3795_vm1, %v3794_v1  ;;  %3255 = vmatpush3.bf16.msra.mxu0 %v3493_v20 }
 0x31b   :  { %3268 = vmatprep.subr.bf16.mxu0 %v3794_v1  ;;  %3261 = vmatpush3.bf16.msra.mxu1 %v3494_v54 }
 0x31c   :  { %3262 = vmatprep.subr.bf16.mxu1 %v3794_v1 }
 0x3d5   :  { %v439_v21 = vpop.f32.mrf.mxu0 }
 0x3d7   :  { %v3244_v22 = vpop.f32.mrf.mxu0 }
 0x3d9   :  { %v442_v23 = vpop.f32.mrf.mxu0  ;;  %v485_v24 = vpop.f32.mrf.mxu1 }
 0x3da   :  { %v492_v25 = vpack.c.bf16 %v485_v24, %v439_v21 }
 0x3db   :  { %v3245_v26 = vpop.f32.mrf.mxu0  ;;  %v3250_v27 = vpop.f32.mrf.mxu1 }
 0x3dc   :  { %3257 = vmatmul.mubr.msk.bf16.vlgmr.msra.gmra.mxu0 %vm113_vm0, %v492_v25 }
 0x3dd   :  { %v488_v28 = vpop.f32.mrf.mxu1  ;;  %3276 = vmatprep.mubr.msk.bf16.mxu0 %vm3795_vm1, %v3794_v1  ;;  %3269 = vmatpush3.bf16.msra.mxu0 %v3496_v14  ;;  %v3503_v14 = vld [vmem:[%s4449_s2 + $0x30] ss:$12 sps:$4 sm:$0xff]  }
 0x3de   :  { %3270 = vmatprep.subr.bf16.mxu0 %v3794_v1 }
 0x3df   :  { %v3251_v29 = vpop.f32.mrf.mxu1 }
 0x3e1   :  { %3271 = vmatpush3.bf16.msra.mxu0 %v3497_v15 }
 0x3e2   :  { %3272 = vmatprep.subr.bf16.mxu0 %v3794_v1 }
 0x3e5   :  { %3273 = vmatpush3.bf16.msra.mxu0 %v3498_v16 }
 0x3e6   :  { %3274 = vmatprep.subr.bf16.mxu0 %v3794_v1 }
 0x3e9   :  { %3275 = vmatpush3.bf16.msra.mxu0 %v3499_v18 }
 0x3ea   :  { %3288 = vmatprep.subr.bf16.mxu0 %v3794_v1 }
 0x49c   :  { %v550_v33 = vpop.f32.mrf.mxu0 }
 0x49d   :  { %v551_v34 = vadd.f32 %v550_v33, %v500_v31 }
 0x49e   :  { %v3258_v35 = vpop.f32.mrf.mxu0 }
 0x49f   :  { %v557_v36 = vadd.f32 %v551_v34, %v3904_v6 }
 0x4a0   :  { %v553_v37 = vpop.f32.mrf.mxu0 }
 0x4a1   :  { %v554_v38 = vadd.f32 %v553_v37, %v500_v31  ;;  %v559_v39 = vsel %vm113_vm0, %v557_v36, 0.0 }
 0x4a2   :  { %560 = vadd.xlane.f32.xlu0 %v559_v39  ;;  %v3259_v40 = vpop.f32.mrf.mxu0 }
 0x4a3   :  { %v558_v41 = vadd.f32 %v554_v38, %v3906_v7  ;;  %v3495_v7 = vld [vmem:[#allocation8] sm:$0xff]  }
 0x4a4   :  { %3263 = vmatpush3.bf16.msra.mxu1 %v3495_v7 }
 0x4a5   :  { %v562_v42 = vsel %vm113_vm0, %v558_v41, 0.0 }
 0x4a6   :  { %563 = vadd.xlane.f32.xlu1 %v562_v42 }
 0x52b   :  { %v561_v43 = vpop.xlane.xlu0 %560 }
 0x52c   :  { %v566_v45 = vmul.f32 0.03125, %v561_v43 }
 0x52e   :  { %v568_v46 = vsub.f32 %v557_v36, %v566_v45 }
 0x52f   :  { %v564_v47 = vpop.xlane.xlu1 %563 }
 0x530   :  { %v567_v49 = vmul.f32 0.03125, %v564_v47  ;;  %v570_v50 = vmul.f32 %v568_v46, %v568_v46 }
 0x532   :  { %v569_v51 = vsub.f32 %v558_v41, %v567_v49  ;;  %v572_v6 = vsel %vm113_vm0, %v570_v50, 0.0  ;;  %v4029_v49 = vsub.s32 3, %v3931_v12 }
 0x533   :  { %573 = vadd.xlane.f32.xlu0 %v572_v6 }
 0x534   :  { %v571_v52 = vmul.f32 %v569_v51, %v569_v51  ;;  %v696_v50 = vrot.slane %v3989_v30, %v4029_v49 }
 0x536   :  { %v575_v53 = vsel %vm113_vm0, %v571_v52, 0.0 }
 0x537   :  { %576 = vadd.xlane.f32.xlu1 %v575_v53 }
 0x5bc   :  { %v574_v55 = vpop.xlane.xlu0 %573 }
 0x5bd   :  { %v578_v56 = vmul.f32 0.03125, %v574_v55 }
 0x5bf   :  { %v580_v57 = vadd.f32 1e-12, %v578_v56 }
 0x5c0   :  { %v577_v58 = vpop.xlane.xlu1 %576 }
 0x5c1   :  { %3558 = vrsqrt.f32 %v580_v57  ;;  %v579_v59 = vmul.f32 0.03125, %v577_v58 }
 0x5c3   :  { %v581_v60 = vadd.f32 1e-12, %v579_v59 }
 0x5c5   :  { %3560 = vrsqrt.f32 %v581_v60 }
 0x5ce   :  { %v3559_v61 = vpop.eup %3558 }
 0x5cf   :  { %v584_v62 = vmul.f32 %v3559_v61, %v568_v46 }
 0x5d1   :  { %v590_v4 = vmul.f32 %v589_v63, %v584_v62 }
 0x5d2   :  { %v3561_v2 = vpop.eup %3560 }
 0x5d3   :  { %v585_v3 = vmul.f32 %v3561_v2, %v569_v51  ;;  %v596_v9 = vadd.f32 %v595_v5, %v590_v4 }
 0x5d5   :  { %v591_v8 = vmul.f32 %v589_v63, %v585_v3 }
 0x5d7   :  { %v597_v10 = vadd.f32 %v595_v5, %v591_v8 }
 0x5d9   :  { %v598_v11 = vpack.c.bf16 %v597_v10, %v596_v9 }
 0x5db   :  { %3265 = vmatmul.mubr.msk.bf16.vlgmr.msra.gmra.mxu1 %vm113_vm0, %v598_v11  ;;  %v3505_v11 = vld [vmem:[%s4449_s2 + $0x34] ss:$12 sps:$4 sm:$0xff]  }
 0x5dc   :  { %904 = vmatprep.mubr.bf16.mxu1 %v3793_v0 }
 0x69b   :  { %v659_v20 = vpop.f32.mrf.mxu1 }
 0x69c   :  { %v660_v21 = vadd.f32 %v2990_v19, %v659_v20 }
 0x69d   :  { %v3266_v22 = vpop.f32.mrf.mxu1 }
 0x69e   :  { %v668_v23 = vmul.f32 0.044715, %v660_v21  ;;  %v666_v41 = vmul.f32 0.5, %v660_v21  ;;  %v4051_v22 = vsub.s32 4, %v3931_v12 }
 0x69f   :  { %v662_v24 = vpop.f32.mrf.mxu1 }
 0x6a0   :  { %v670_v25 = vmul.f32 %v668_v23, %v660_v21  ;;  %v663_v26 = vadd.f32 %v2990_v19, %v662_v24  ;;  %v4054_v23 = vsub.s32 5, %v3931_v12  ;;  %v797_v24 = vrot.slane %v3989_v30, %v4051_v22  ;;  %v3506_v12 = vld [vmem:[%s4449_s2 + $0x50] ss:$12 sps:$4 sm:$0xff]  }
 0x6a1   :  { %v3267_v27 = vpop.f32.mrf.mxu1 }
 0x6a2   :  { %v672_v28 = vmul.f32 %v670_v25, %v660_v21  ;;  %v669_v29 = vmul.f32 0.044715, %v663_v26  ;;  %v667_v42 = vmul.f32 0.5, %v663_v26 }
 0x6a4   :  { %v674_v31 = vadd.f32 %v672_v28, %v660_v21  ;;  %v671_v33 = vmul.f32 %v669_v29, %v663_v26 }
 0x6a6   :  { %v676_v34 = vmul.f32 0.7978846, %v674_v31  ;;  %v673_v35 = vmul.f32 %v671_v33, %v663_v26 }
 0x6a8   :  { %3562 = vtanh.f32 %v676_v34  ;;  %v675_v36 = vadd.f32 %v673_v35, %v663_v26  ;;  %v803_v26 = vrot.slane %v3989_v30, %v4054_v23 }
 0x6aa   :  { %v677_v37 = vmul.f32 0.7978846, %v675_v36  ;;  %v3507_v36 = vld [vmem:[%s4449_s2 + $0x38] ss:$12 sps:$4 sm:$0xff]  }
 0x6ac   :  { %3564 = vtanh.f32 %v677_v37  ;;  %v820_v37 = vld [vmem:[#allocation5 + $0x3] sm:$0x7] }
 0x6b5   :  { %v3563_v38 = vpop.eup %3562 }
 0x6b6   :  { %v680_v39 = vadd.f32 1.0, %v3563_v38  ;;  %v829_v38 = vrot.slane %v820_v37, %v3934_v13 }
 0x6b8   :  { %v682_v45 = vmul.f32 %v680_v39, %v666_v41 }
 0x6b9   :  { %v3565_v40 = vpop.eup %3564 }
 0x6ba   :  { %v681_v43 = vadd.f32 1.0, %v3565_v40 }
 0x6bc   :  { %v683_v46 = vmul.f32 %v681_v43, %v667_v42  ;;  %v825_v43 = vrot.slane %v820_v37, %v3938_v17 }
 0x6be   :  { %v684_v47 = vpack.c.bf16 %v683_v46, %v682_v45  ;;  %v833_v46 = vrot.slane %v820_v37, %v3952_v32 }
 0x6c0   :  { %3277 = vmatmul.mubr.msk.bf16.vlgmr.msra.gmra.mxu0 %vm721_vm4, %v684_v47 }
 0x6c1   :  { %3290 = vmatprep.mubr.msk.bf16.mxu0 %vm3795_vm1, %v3794_v1 }
 0x780   :  { %v759_v51 = vpop.f32.mrf.mxu0 }
 0x781   :  { %v760_v6 = vadd.f32 %v759_v51, %v696_v50 }
 0x782   :  { %v3278_v52 = vpop.f32.mrf.mxu0 }
 0x783   :  { %v766_v53 = vadd.f32 %v760_v6, %v596_v9  ;;  %v3502_v9 = vld [vmem:[%s4449_s2 + $0x4c] ss:$12 sps:$4 sm:$0xff]  }
 0x784   :  { %v762_v54 = vpop.f32.mrf.mxu0  ;;  %884 = vmatprep.subr.bf16.mxu1 %v3502_v9 }
 0x785   :  { %v763_v7 = vadd.f32 %v762_v54, %v696_v50  ;;  %v768_v55 = vsel %vm113_vm0, %v766_v53, 0.0 }
 0x786   :  { %769 = vadd.xlane.f32.xlu0 %v768_v55  ;;  %v3279_v56 = vpop.f32.mrf.mxu0 }
 0x787   :  { %v767_v57 = vadd.f32 %v763_v7, %v597_v10  ;;  %v3500_v10 = vld [vmem:[%s4449_s2 + $0x48] ss:$12 sps:$4 sm:$0xff]  }
 0x788   :  { %885 = vmatpush1.bf16.msra.mxu1 %v3500_v10 }
 0x789   :  { %v771_v58 = vsel %vm113_vm0, %v767_v57, 0.0  ;;  %886 = vmatprep.subr.bf16.mxu1 %v3505_v11 }
 0x78a   :  { %772 = vadd.xlane.f32.xlu1 %v771_v58 }
 0x78c   :  { %887 = vmatpush1.bf16.msra.mxu1 %v3503_v14 }
 0x78d   :  { %3280 = vmatprep.subr.bf16.mxu1 %v3794_v1 }
 0x80f   :  { %v770_v59 = vpop.xlane.xlu0 %769 }
 0x810   :  { %v774_v60 = vmul.f32 0.03125, %v770_v59 }
 0x812   :  { %v776_v61 = vsub.f32 %v766_v53, %v774_v60 }
 0x813   :  { %v773_v62 = vpop.xlane.xlu1 %772 }
 0x814   :  { %v775_v63 = vmul.f32 0.03125, %v773_v62  ;;  %v778_v2 = vmul.f32 %v776_v61, %v776_v61 }
 0x816   :  { %v777_v3 = vsub.f32 %v767_v57, %v775_v63  ;;  %v780_v4 = vsel %vm113_vm0, %v778_v2, 0.0 }
 0x817   :  { %781 = vadd.xlane.f32.xlu0 %v780_v4 }
 0x818   :  { %v779_v5 = vmul.f32 %v777_v3, %v777_v3 }
 0x81a   :  { %v783_v8 = vsel %vm113_vm0, %v779_v5, 0.0 }
 0x81b   :  { %784 = vadd.xlane.f32.xlu1 %v783_v8 }
 0x8a0   :  { %v782_v15 = vpop.xlane.xlu0 %781 }
 0x8a1   :  { %v786_v16 = vmul.f32 0.03125, %v782_v15 }
 0x8a3   :  { %v788_v18 = vadd.f32 1e-12, %v786_v16 }
 0x8a4   :  { %v785_v19 = vpop.xlane.xlu1 %784 }
 0x8a5   :  { %3566 = vrsqrt.f32 %v788_v18  ;;  %v787_v20 = vmul.f32 0.03125, %v785_v19 }
 0x8a7   :  { %v789_v21 = vadd.f32 1e-12, %v787_v20 }
 0x8a9   :  { %3568 = vrsqrt.f32 %v789_v21 }
 0x8b2   :  { %v3567_v25 = vpop.eup %3566 }
 0x8b3   :  { %v792_v27 = vmul.f32 %v3567_v25, %v776_v61 }
 0x8b5   :  { %v798_v28 = vmul.f32 %v797_v24, %v792_v27 }
 0x8b6   :  { %v3569_v29 = vpop.eup %3568 }
 0x8b7   :  { %v4060_v31 = vadd.f32 %v803_v26, %v798_v28  ;;  %v793_v33 = vmul.f32 %v3569_v29, %v777_v3 }
 0x8b9   :  { %807 = vst.msk [vmem:[#allocation11 + $0x10] sm:$0xff] %vm113_vm0, %v4060_v31  ;;  %v799_v34 = vmul.f32 %v797_v24, %v793_v33 }
 0x8bb   :  { %v4064_v35 = vadd.f32 %v803_v26, %v799_v34 }
 0x8bd   :  { %808 = vst.msk [vmem:[#allocation11 + $0x18] sm:$0xff] %vm113_vm0, %v4064_v35  ;;  %v809_v30 = vpack.c.bf16 %v4064_v35, %v4060_v31 }
 0x8bf   :  { %3013 = vmatmul.mubr.msk.bf16.vlgmr.msra.gmra.mxu1 %vm113_vm0, %v809_v30 }
 0x8c0   :  { %3281 = vmatpush3.bf16.msra.mxu1 %v3506_v12  ;;  %3284 = vmatprep.mubr.msk.bf16.mxu1 %vm3795_vm1, %v3794_v1 }
 0x8c1   :  { %3282 = vmatprep.subr.bf16.mxu1 %v3794_v1 }
 0x8c4   :  { %3283 = vmatpush3.bf16.msra.mxu1 %v3507_v36 }
 0x8c5   :  { %3294 = vmatprep.subr.bf16.mxu1 %v3794_v1 }
 0x8c7   :  { %3285 = vmatmul.mubr.msk.bf16.vlgmr.msra.gmra.mxu1 %vm113_vm0, %v809_v30 }
 0x8c8   :  { %3296 = vmatprep.mubr.msk.bf16.mxu1 %vm3795_vm1, %v3794_v1 }
 0x97f   :  { %v906_v39 = vpop.f32.mrf.mxu1 }
 0x980   :  { %v907_v52 = vadd.f32 %v906_v39, %v825_v43 }
 0x981   :  { %v908_v40 = vpop.f32.mrf.mxu1 }
 0x982   :  { %v909_v41 = vadd.f32 %v908_v40, %v829_v38  ;;  %v956_v58 = vpack.c.bf16 %v907_v52, %v907_v52 }
 0x983   :  { %v910_v42 = vpop.f32.mrf.mxu1 }
 0x984   :  { %v958_v45 = vpack.c.bf16 %v909_v41, %v909_v41  ;;  %v911_v59 = vadd.f32 %v910_v42, %v825_v43  ;;  %v3508_v41 = vld [vmem:[#allocation7 + $0x18] sm:$0xff]   ;;  %v3509_v42 = vld [vmem:[#allocation7 + $0x10] sm:$0xff]  }
 0x985   :  { %v912_v47 = vpop.f32.mrf.mxu1 }
 0x986   :  { %v964_v50 = vsel %vm113_vm0, %v958_v45, 0  ;;  %v913_v51 = vadd.f32 %v912_v47, %v829_v38  ;;  %v957_v2 = vpack.c.bf16 %v911_v59, %v911_v59 }
 0x987   :  { %v949_v6 = vpop.f32.mrf.mxu1  ;;  %3289 = vmatpush3.bf16.xpose.msra.mxu0 %v964_v50 }
 0x988   :  { %v959_v53 = vpack.c.bf16 %v913_v51, %v913_v51  ;;  %v950_v54 = vadd.f32 %v949_v6, %v833_v46  ;;  %3300 = vmatprep.subr.bf16.mxu0 %v3794_v1 }
 0x989   :  { %v3286_v7 = vpop.f32.mrf.mxu1 }
 0x98a   :  { %v1010_v55 = vsel %vm113_vm0, %v959_v53, 0  ;;  %v1076_v56 = vpack.c.bf16 %v950_v54, %v950_v54  ;;  %v4121_v54 = vld [vmem:[%s4454_s7 + $0x8] sm:$0x3f] }
 0x98b   :  { %v952_v57 = vpop.f32.mrf.mxu1  ;;  %3295 = vmatpush3.bf16.xpose.msra.mxu1 %v1010_v55  ;;  %v1181_v7 = vrot.slane %v4121_v54, %v3938_v17 }
 0x98c   :  { %v953_v60 = vadd.f32 %v952_v57, %v833_v46  ;;  %3306 = vmatprep.subr.bf16.mxu1 %v3794_v1  ;;  %v1082_v62 = vsel %vm401_vm2, %v1076_v56, 0 }
 0x98d   :  { %v3287_v61 = vpop.f32.mrf.mxu1 }
 0x98e   :  { %v1077_v63 = vpack.c.bf16 %v953_v60, %v953_v60  ;;  %3291 = vmatmul.mubr.msk.bf16.vlgmr.msra.gmra.mxu0 %vm113_vm0, %v956_v58 }
 0x98f   :  { %3301 = vmatpush3.bf16.msra.mxu0 %v1082_v62  ;;  %3302 = vmatprep.mubr.msk.bf16.mxu0 %vm3795_vm1, %v3794_v1 }
 0x990   :  { %3312 = vmatprep.subr.bf16.mxu0 %v3794_v1  ;;  %v1128_v3 = vsel %vm401_vm2, %v1077_v63, 0 }
 0x992   :  { %3297 = vmatmul.mubr.msk.bf16.vlgmr.msra.gmra.mxu1 %vm113_vm0, %v957_v2 }
 0x993   :  { %3307 = vmatpush3.bf16.msra.mxu1 %v1128_v3  ;;  %3308 = vmatprep.mubr.msk.bf16.mxu1 %vm3795_vm1, %v3794_v1 }
 0x994   :  { %3320 = vmatprep.subr.bf16.mxu1 %v3794_v1 }
 0xa4e   :  { %v1000_v4 = vpop.f32.mrf.mxu0 }
 0xa4f   :  { %v1001_v5 = vadd.f32 %v3962_v44, %v1000_v4 }
 0xa50   :  { %v3292_v8 = vpop.f32.mrf.mxu0 }
 0xa51   :  { %v1052_v9 = vsel %vm371_vm3, %v1001_v5, -inf }
 0xa52   :  { %v1046_v10 = vpop.f32.mrf.mxu1  ;;  %1053 = vmax.xlane.f32.xlu0 %v1052_v9  ;;  %v1003_v11 = vpop.f32.mrf.mxu0 }
 0xa53   :  { %v1047_v14 = vadd.f32 %v3968_v48, %v1046_v10 }
 0xa54   :  { %v3293_v15 = vpop.f32.mrf.mxu0  ;;  %v3298_v16 = vpop.f32.mrf.mxu1 }
 0xa55   :  { %v1055_v18 = vsel %vm371_vm3, %v1047_v14, -inf }
 0xa56   :  { %1056 = vmax.xlane.f32.xlu1 %v1055_v18  ;;  %v1049_v19 = vpop.f32.mrf.mxu1  ;;  %v3510_v18 = vld [vmem:[#allocation8 + $0x18] sm:$0xff]  }
 0xa57   :  { %v3511_v19 = vld [vmem:[#allocation8 + $0x10] sm:$0xff]  }
 0xa58   :  { %v3299_v20 = vpop.f32.mrf.mxu1 }
 0xadb   :  { %v1054_v21 = vpop.xlane.xlu0 %1053 }
 0xadc   :  { %v1058_v24 = vsub.f32 %v1001_v5, %v1054_v21 }
 0xade   :  { %v1060_v25 = vmul.f32 1.442695, %v1058_v24 }
 0xadf   :  { %v1057_v26 = vpop.xlane.xlu1 %1056 }
 0xae0   :  { %3570 = vpow2.f32 %v1060_v25  ;;  %v1059_v44 = vsub.f32 %v1047_v14, %v1057_v26 }
 0xae2   :  { %v1062_v27 = vmul.f32 1.442695, %v1059_v44 }
 0xae4   :  { %3572 = vpow2.f32 %v1062_v27 }
 0xaed   :  { %v3571_v28 = vpop.eup %3570 }
 0xaee   :  { %v1064_v29 = vsel %vm371_vm3, %v3571_v28, 0.0 }
 0xaef   :  { %1065 = vadd.xlane.f32.xlu0 %v1064_v29  ;;  %v1269_v29 = vrot.slane %v4121_v54, %v3934_v13 }
 0xaf1   :  { %v3573_v48 = vpop.eup %3572 }
 0xaf2   :  { %v1067_v33 = vsel %vm371_vm3, %v3573_v48, 0.0 }
 0xaf3   :  { %1068 = vadd.xlane.f32.xlu1 %v1067_v33 }
 0xb78   :  { %v1066_v34 = vpop.xlane.xlu0 %1065 }
 0xb79   :  { %3574 = vrcp.f32 %v1066_v34 }
 0xb7c   :  { %v1069_v12 = vpop.xlane.xlu1 %1068 }
 0xb7d   :  { %3576 = vrcp.f32 %v1069_v12  ;;  %v1275_v12 = vrot.slane %v4121_v54, %v3952_v32 }
 0xb86   :  { %v3575_v30 = vpop.eup %3574 }
 0xb87   :  { %v1072_v36 = vmul.f32 %v3575_v30, %v3571_v28 }
 0xb89   :  { %v1074_v37 = vpack.c.bf16 %v1072_v36, %v1072_v36 }
 0xb8a   :  { %v3577_v38 = vpop.eup %3576 }
 0xb8b   :  { %3303 = vmatmul.mubr.msk.bf16.vlgmr.msra.gmra.mxu0 %vm371_vm3, %v1074_v37  ;;  %v1073_v39 = vmul.f32 %v3577_v38, %v3573_v48 }
 0xb8c   :  { %3316 = vmatprep.mubr.msk.bf16.mxu0 %vm3795_vm1, %v3794_v1  ;;  %3313 = vmatpush3.bf16.msra.mxu0 %v3508_v41  ;;  %v3514_v41 = vld [vmem:[%s4453_s6 + $0x28] sm:$0xff]  }
 0xb8d   :  { %v1075_v40 = vpack.c.bf16 %v1073_v39, %v1073_v39  ;;  %3314 = vmatprep.subr.bf16.mxu0 %v3794_v1  ;;  %v3512_v39 = vld [vmem:[%s4453_s6 + $0x38] sm:$0xff]  }
 0xb8f   :  { %3309 = vmatmul.mubr.msk.bf16.vlgmr.msra.gmra.mxu1 %vm371_vm3, %v1075_v40  ;;  %v3513_v40 = vld [vmem:[%s4453_s6 + $0x30] sm:$0xff]  }
 0xb90   :  { %3324 = vmatprep.mubr.msk.bf16.mxu1 %vm3795_vm1, %v3794_v1  ;;  %3315 = vmatpush3.bf16.msra.mxu0 %v3509_v42  ;;  %v3515_v42 = vld [vmem:[%s4453_s6 + $0x20] sm:$0xff]  }
 0xb91   :  { %3328 = vmatprep.subr.bf16.mxu0 %v3794_v1  ;;  %3321 = vmatpush3.bf16.msra.mxu1 %v3510_v18 }
 0xb92   :  { %3322 = vmatprep.subr.bf16.mxu1 %v3794_v1 }
 0xb95   :  { %3323 = vmatpush3.bf16.msra.mxu1 %v3511_v19 }
 0xc4b   :  { %v1118_v43 = vpop.f32.mrf.mxu0 }
 0xc4d   :  { %v3304_v45 = vpop.f32.mrf.mxu0 }
 0xc4f   :  { %v1121_v46 = vpop.f32.mrf.mxu0  ;;  %v1164_v47 = vpop.f32.mrf.mxu1 }
 0xc50   :  { %v1172_v50 = vpack.c.bf16 %v1164_v47, %v1118_v43  ;;  %v3024_v43 = vld [vmem:[%s4455_s8 + $0x1] ss:$0 sm:$0xff] }
 0xc51   :  { %v3305_v51 = vpop.f32.mrf.mxu0  ;;  %v3310_v6 = vpop.f32.mrf.mxu1 }
 0xc52   :  { %3317 = vmatmul.mubr.msk.bf16.vlgmr.msra.gmra.mxu0 %vm113_vm0, %v1172_v50 }
 0xc53   :  { %v1167_v52 = vpop.f32.mrf.mxu1  ;;  %3336 = vmatprep.mubr.msk.bf16.mxu0 %vm3795_vm1, %v3794_v1  ;;  %3329 = vmatpush3.bf16.msra.mxu0 %v3512_v39  ;;  %v3521_v39 = vld [vmem:[%s4449_s2 + $0x64] ss:$12 sps:$4 sm:$0xff]  }
 0xc54   :  { %3330 = vmatprep.subr.bf16.mxu0 %v3794_v1 }
 0xc55   :  { %v3311_v53 = vpop.f32.mrf.mxu1 }
 0xc57   :  { %3331 = vmatpush3.bf16.msra.mxu0 %v3513_v40  ;;  %v3519_v40 = vld [vmem:[%s4449_s2 + $0x60] ss:$12 sps:$4 sm:$0xff]  }
 0xc58   :  { %3332 = vmatprep.subr.bf16.mxu0 %v3794_v1 }
 0xc5b   :  { %3333 = vmatpush3.bf16.msra.mxu0 %v3514_v41 }
 0xc5c   :  { %3334 = vmatprep.subr.bf16.mxu0 %v3794_v1 }
 0xc5f   :  { %3335 = vmatpush3.bf16.msra.mxu0 %v3515_v42 }
 0xc60   :  { %3348 = vmatprep.subr.bf16.mxu0 %v3794_v1 }
 0xd12   :  { %v1231_v55 = vpop.f32.mrf.mxu0 }
 0xd13   :  { %v1232_v56 = vadd.f32 %v1231_v55, %v1181_v7 }
 0xd14   :  { %v3318_v57 = vpop.f32.mrf.mxu0 }
 0xd15   :  { %v1238_v58 = vadd.f32 %v1232_v56, %v4060_v31 }
 0xd16   :  { %v1234_v59 = vpop.f32.mrf.mxu0 }
 0xd17   :  { %v1235_v60 = vadd.f32 %v1234_v59, %v1181_v7  ;;  %v1240_v61 = vsel %vm113_vm0, %v1238_v58, 0.0 }
 0xd18   :  { %1241 = vadd.xlane.f32.xlu0 %v1240_v61  ;;  %v3319_v62 = vpop.f32.mrf.mxu0 }
 0xd19   :  { %v1239_v63 = vadd.f32 %v1235_v60, %v4064_v35 }
 0xd1b   :  { %v1243_v2 = vsel %vm113_vm0, %v1239_v63, 0.0 }
 0xd1c   :  { %1244 = vadd.xlane.f32.xlu1 %v1243_v2 }
 0xda1   :  { %v1242_v3 = vpop.xlane.xlu0 %1241 }
 0xda2   :  { %v1246_v4 = vmul.f32 0.03125, %v1242_v3 }
 0xda4   :  { %v1248_v5 = vsub.f32 %v1238_v58, %v1246_v4 }
 0xda5   :  { %v1245_v8 = vpop.xlane.xlu1 %1244 }
 0xda6   :  { %v1247_v9 = vmul.f32 0.03125, %v1245_v8  ;;  %v1250_v10 = vmul.f32 %v1248_v5, %v1248_v5 }
 0xda8   :  { %v1249_v11 = vsub.f32 %v1239_v63, %v1247_v9  ;;  %v1252_v14 = vsel %vm113_vm0, %v1250_v10, 0.0 }
 0xda9   :  { %1253 = vadd.xlane.f32.xlu0 %v1252_v14 }
 0xdaa   :  { %v1251_v15 = vmul.f32 %v1249_v11, %v1249_v11 }
 0xdac   :  { %v1255_v16 = vsel %vm113_vm0, %v1251_v15, 0.0 }
 0xdad   :  { %1256 = vadd.xlane.f32.xlu1 %v1255_v16 }
 0xe32   :  { %v1254_v20 = vpop.xlane.xlu0 %1253 }
 0xe33   :  { %v1258_v21 = vmul.f32 0.03125, %v1254_v20 }
 0xe35   :  { %v1260_v24 = vadd.f32 1e-12, %v1258_v21 }
 0xe36   :  { %v1257_v25 = vpop.xlane.xlu1 %1256 }
 0xe37   :  { %3578 = vrsqrt.f32 %v1260_v24  ;;  %v1259_v26 = vmul.f32 0.03125, %v1257_v25 }
 0xe39   :  { %v1261_v44 = vadd.f32 1e-12, %v1259_v26 }
 0xe3b   :  { %3580 = vrsqrt.f32 %v1261_v44 }
 0xe44   :  { %v3579_v27 = vpop.eup %3578 }
 0xe45   :  { %v1264_v28 = vmul.f32 %v3579_v27, %v1248_v5 }
 0xe47   :  { %v1270_v34 = vmul.f32 %v1269_v29, %v1264_v28 }
 0xe48   :  { %v3581_v48 = vpop.eup %3580 }
 0xe49   :  { %v1265_v33 = vmul.f32 %v3581_v48, %v1249_v11  ;;  %v1276_v36 = vadd.f32 %v1275_v12, %v1270_v34  ;;  %v1379_v11 = vrot.slane %v4121_v54, %v4029_v49 }
 0xe4b   :  { %v1271_v30 = vmul.f32 %v1269_v29, %v1265_v33 }
 0xe4d   :  { %v1277_v37 = vadd.f32 %v1275_v12, %v1271_v30 }
 0xe4f   :  { %v1278_v38 = vpack.c.bf16 %v1277_v37, %v1276_v36 }
 0xe51   :  { %3325 = vmatmul.mubr.msk.bf16.vlgmr.msra.gmra.mxu1 %vm113_vm0, %v1278_v38  ;;  %v3516_v38 = vld [vmem:[%s4449_s2 + $0x78] ss:$12 sps:$4 sm:$0xff]  }
 0xe52   :  { %1586 = vmatprep.mubr.bf16.mxu1 %v3793_v0 }
 0xf11   :  { %v1341_v45 = vpop.f32.mrf.mxu1 }
 0xf12   :  { %v1342_v46 = vadd.f32 %v3024_v43, %v1341_v45 }
 0xf13   :  { %v3326_v47 = vpop.f32.mrf.mxu1 }
 0xf14   :  { %v1350_v50 = vmul.f32 0.044715, %v1342_v46  ;;  %v1348_v3 = vmul.f32 0.5, %v1342_v46 }
 0xf15   :  { %v1344_v51 = vpop.f32.mrf.mxu1 }
 0xf16   :  { %v1352_v6 = vmul.f32 %v1350_v50, %v1342_v46  ;;  %v1345_v52 = vadd.f32 %v3024_v43, %v1344_v51  ;;  %v1479_v50 = vrot.slane %v4121_v54, %v4051_v22 }
 0xf17   :  { %v3327_v53 = vpop.f32.mrf.mxu1 }
 0xf18   :  { %v1354_v7 = vmul.f32 %v1352_v6, %v1342_v46  ;;  %v1351_v55 = vmul.f32 0.044715, %v1345_v52  ;;  %v1349_v4 = vmul.f32 0.5, %v1345_v52  ;;  %v1485_v6 = vrot.slane %v4121_v54, %v4054_v23 }
 0xf1a   :  { %v1356_v56 = vadd.f32 %v1354_v7, %v1342_v46  ;;  %v1353_v57 = vmul.f32 %v1351_v55, %v1345_v52 }
 0xf1c   :  { %v1358_v58 = vmul.f32 0.7978846, %v1356_v56  ;;  %v1355_v59 = vmul.f32 %v1353_v57, %v1345_v52 }
 0xf1e   :  { %3582 = vtanh.f32 %v1358_v58  ;;  %v1357_v60 = vadd.f32 %v1355_v59, %v1345_v52  ;;  %v3522_v59 = vld [vmem:[%s4449_s2 + $0x80] ss:$12 sps:$4 sm:$0xff]  }
 0xf20   :  { %v1359_v61 = vmul.f32 0.7978846, %v1357_v60  ;;  %v3523_v60 = vld [vmem:[%s4449_s2 + $0x68] ss:$12 sps:$4 sm:$0xff]  }
 0xf22   :  { %3584 = vtanh.f32 %v1359_v61  ;;  %v1502_v61 = vld [vmem:[#allocation5 + $0x6] sm:$0x7] }
 0xf2b   :  { %v3583_v62 = vpop.eup %3582 }
 0xf2c   :  { %v1362_v63 = vadd.f32 1.0, %v3583_v62  ;;  %v1511_v62 = vrot.slane %v1502_v61, %v3934_v13 }
 0xf2e   :  { %v1364_v8 = vmul.f32 %v1362_v63, %v1348_v3 }
 0xf2f   :  { %v3585_v2 = vpop.eup %3584 }
 0xf30   :  { %v1363_v5 = vadd.f32 1.0, %v3585_v2 }
 0xf32   :  { %v1365_v9 = vmul.f32 %v1363_v5, %v1349_v4  ;;  %v1507_v5 = vrot.slane %v1502_v61, %v3938_v17 }
 0xf34   :  { %v1366_v10 = vpack.c.bf16 %v1365_v9, %v1364_v8  ;;  %v1515_v9 = vrot.slane %v1502_v61, %v3952_v32 }
 0xf36   :  { %3337 = vmatmul.mubr.msk.bf16.vlgmr.msra.gmra.mxu0 %vm721_vm4, %v1366_v10 }
 0xf37   :  { %3350 = vmatprep.mubr.msk.bf16.mxu0 %vm3795_vm1, %v3794_v1 }
 0xff6   :  { %v1441_v14 = vpop.f32.mrf.mxu0 }
 0xff7   :  { %v1442_v15 = vadd.f32 %v1441_v14, %v1379_v11 }
 0xff8   :  { %v3338_v16 = vpop.f32.mrf.mxu0 }
 0xff9   :  { %v1448_v18 = vadd.f32 %v1442_v15, %v1276_v36 }
 0xffa   :  { %v1444_v19 = vpop.f32.mrf.mxu0 }
 0xffb   :  { %v1445_v20 = vadd.f32 %v1444_v19, %v1379_v11  ;;  %v1450_v21 = vsel %vm113_vm0, %v1448_v18, 0.0 }
 0xffc   :  { %1451 = vadd.xlane.f32.xlu0 %v1450_v21  ;;  %v3339_v24 = vpop.f32.mrf.mxu0 }
 0xffd   :  { %v1449_v25 = vadd.f32 %v1445_v20, %v1277_v37  ;;  %v3518_v37 = vld [vmem:[%s4449_s2 + $0x7c] ss:$12 sps:$4 sm:$0xff]  }
 0xffe   :  { %1566 = vmatprep.subr.bf16.mxu1 %v3518_v37 }
 0xfff   :  { %v1453_v26 = vsel %vm113_vm0, %v1449_v25, 0.0  ;;  %1567 = vmatpush1.bf16.msra.mxu1 %v3516_v38 }
0x1000   :  { %1454 = vadd.xlane.f32.xlu1 %v1453_v26  ;;  %1568 = vmatprep.subr.bf16.mxu1 %v3521_v39 }
0x1003   :  { %1569 = vmatpush1.bf16.msra.mxu1 %v3519_v40 }
0x1004   :  { %3340 = vmatprep.subr.bf16.mxu1 %v3794_v1 }
0x1085   :  { %v1452_v44 = vpop.xlane.xlu0 %1451 }
0x1086   :  { %v1456_v27 = vmul.f32 0.03125, %v1452_v44 }
0x1088   :  { %v1458_v28 = vsub.f32 %v1448_v18, %v1456_v27 }
0x1089   :  { %v1455_v29 = vpop.xlane.xlu1 %1454 }
0x108a   :  { %v1457_v48 = vmul.f32 0.03125, %v1455_v29  ;;  %v1460_v33 = vmul.f32 %v1458_v28, %v1458_v28 }
0x108c   :  { %v1459_v34 = vsub.f32 %v1449_v25, %v1457_v48  ;;  %v1462_v12 = vsel %vm113_vm0, %v1460_v33, 0.0 }
0x108d   :  { %1463 = vadd.xlane.f32.xlu0 %v1462_v12 }
0x108e   :  { %v1461_v30 = vmul.f32 %v1459_v34, %v1459_v34 }
0x1090   :  { %v1465_v36 = vsel %vm113_vm0, %v1461_v30, 0.0  ;;  %v4227_v30 = vld [vmem:[%s4448_s1] ss:$0 sm:$0xff] }
0x1091   :  { %1466 = vadd.xlane.f32.xlu1 %v1465_v36 }
0x1116   :  { %v1464_v41 = vpop.xlane.xlu0 %1463 }
0x1117   :  { %v1468_v42 = vmul.f32 0.03125, %v1464_v41  ;;  %v4234_v41 = vld [vmem:[%s4448_s1 + $0x1] ss:$0 sm:$0xff] }
0x1119   :  { %v1470_v43 = vadd.f32 1e-12, %v1468_v42 }
0x111a   :  { %v1467_v45 = vpop.xlane.xlu1 %1466 }
0x111b   :  { %3586 = vrsqrt.f32 %v1470_v43  ;;  %v1469_v46 = vmul.f32 0.03125, %v1467_v45 }
0x111d   :  { %v1471_v47 = vadd.f32 1e-12, %v1469_v46 }
0x111f   :  { %3588 = vrsqrt.f32 %v1471_v47 }
0x1128   :  { %v3587_v51 = vpop.eup %3586 }
0x1129   :  { %v1474_v52 = vmul.f32 %v3587_v51, %v1458_v28 }
0x112b   :  { %v1480_v53 = vmul.f32 %v1479_v50, %v1474_v52 }
0x112c   :  { %v3589_v7 = vpop.eup %3588 }
0x112d   :  { %v4183_v55 = vadd.f32 %v1485_v6, %v1480_v53  ;;  %v1475_v56 = vmul.f32 %v3589_v7, %v1459_v34 }
0x112f   :  { %1489 = vst.msk [vmem:[#allocation11 + $0x20] sm:$0xff] %vm113_vm0, %v4183_v55  ;;  %v1481_v57 = vmul.f32 %v1479_v50, %v1475_v56 }
0x1131   :  { %v4187_v58 = vadd.f32 %v1485_v6, %v1481_v57 }
0x1133   :  { %1490 = vst.msk [vmem:[#allocation11 + $0x28] sm:$0xff] %vm113_vm0, %v4187_v58  ;;  %v1491_v54 = vpack.c.bf16 %v4187_v58, %v4183_v55 }
0x1135   :  { %3055 = vmatmul.mubr.msk.bf16.vlgmr.msra.gmra.mxu1 %vm113_vm0, %v1491_v54 }
0x1136   :  { %3341 = vmatpush3.bf16.msra.mxu1 %v3522_v59  ;;  %3344 = vmatprep.mubr.msk.bf16.mxu1 %vm3795_vm1, %v3794_v1 }
0x1137   :  { %3342 = vmatprep.subr.bf16.mxu1 %v3794_v1 }
0x113a   :  { %3343 = vmatpush3.bf16.msra.mxu1 %v3523_v60 }
0x113b   :  { %3354 = vmatprep.subr.bf16.mxu1 %v3794_v1 }
0x113d   :  { %3345 = vmatmul.mubr.msk.bf16.vlgmr.msra.gmra.mxu1 %vm113_vm0, %v1491_v54 }
0x113e   :  { %3356 = vmatprep.mubr.msk.bf16.mxu1 %vm3795_vm1, %v3794_v1 }
0x11f5   :  { %v1588_v63 = vpop.f32.mrf.mxu1 }
0x11f6   :  { %v1589_v16 = vadd.f32 %v1588_v63, %v1507_v5 }
0x11f7   :  { %v1590_v2 = vpop.f32.mrf.mxu1 }
0x11f8   :  { %v1591_v3 = vadd.f32 %v1590_v2, %v1511_v62  ;;  %v1638_v26 = vpack.c.bf16 %v1589_v16, %v1589_v16 }
0x11f9   :  { %v1592_v4 = vpop.f32.mrf.mxu1 }
0x11fa   :  { %v1640_v8 = vpack.c.bf16 %v1591_v3, %v1591_v3  ;;  %v1593_v44 = vadd.f32 %v1592_v4, %v1507_v5 }
0x11fb   :  { %v1594_v10 = vpop.f32.mrf.mxu1 }
0x11fc   :  { %v1646_v11 = vsel %vm113_vm0, %v1640_v8, 0  ;;  %v1595_v14 = vadd.f32 %v1594_v10, %v1511_v62  ;;  %v1639_v33 = vpack.c.bf16 %v1593_v44, %v1593_v44  ;;  %v3525_v10 = vld [vmem:[#allocation7 + $0x20] sm:$0xff]  }
0x11fd   :  { %v1631_v15 = vpop.f32.mrf.mxu1  ;;  %3349 = vmatpush3.bf16.xpose.msra.mxu0 %v1646_v11 }
0x11fe   :  { %v1641_v18 = vpack.c.bf16 %v1595_v14, %v1595_v14  ;;  %v1632_v19 = vadd.f32 %v1631_v15, %v1515_v9  ;;  %3360 = vmatprep.subr.bf16.mxu0 %v3794_v1 }
0x11ff   :  { %v3346_v20 = vpop.f32.mrf.mxu1 }
0x1200   :  { %v1692_v21 = vsel %vm113_vm0, %v1641_v18, 0  ;;  %v1758_v24 = vpack.c.bf16 %v1632_v19, %v1632_v19 }
0x1201   :  { %v1634_v25 = vpop.f32.mrf.mxu1  ;;  %3355 = vmatpush3.bf16.xpose.msra.mxu1 %v1692_v21 }
0x1202   :  { %v1635_v27 = vadd.f32 %v1634_v25, %v1515_v9  ;;  %3366 = vmatprep.subr.bf16.mxu1 %v3794_v1  ;;  %v1764_v29 = vsel %vm401_vm2, %v1758_v24, 0  ;;  %v3524_v9 = vld [vmem:[#allocation7 + $0x28] sm:$0xff]   ;;  %v4254_v25 = vld [vmem:[%s4454_s7 + $0x10] sm:$0x3f] }
0x1203   :  { %v3347_v28 = vpop.f32.mrf.mxu1 }
0x1204   :  { %v1759_v48 = vpack.c.bf16 %v1635_v27, %v1635_v27  ;;  %3351 = vmatmul.mubr.msk.bf16.vlgmr.msra.gmra.mxu0 %vm113_vm0, %v1638_v26  ;;  %v1863_v26 = vrot.slane %v4254_v25, %v3938_v17 }
0x1205   :  { %3361 = vmatpush3.bf16.msra.mxu0 %v1764_v29  ;;  %3362 = vmatprep.mubr.msk.bf16.mxu0 %vm3795_vm1, %v3794_v1 }
0x1206   :  { %3372 = vmatprep.subr.bf16.mxu0 %v3794_v1  ;;  %v1810_v34 = vsel %vm401_vm2, %v1759_v48, 0 }
0x1208   :  { %3357 = vmatmul.mubr.msk.bf16.vlgmr.msra.gmra.mxu1 %vm113_vm0, %v1639_v33 }
0x1209   :  { %3367 = vmatpush3.bf16.msra.mxu1 %v1810_v34  ;;  %3368 = vmatprep.mubr.msk.bf16.mxu1 %vm3795_vm1, %v3794_v1 }
0x120a   :  { %3380 = vmatprep.subr.bf16.mxu1 %v3794_v1 }
0x12c4   :  { %v1682_v12 = vpop.f32.mrf.mxu0 }
0x12c5   :  { %v1683_v36 = vadd.f32 %v4227_v30, %v1682_v12 }
0x12c6   :  { %v3352_v37 = vpop.f32.mrf.mxu0 }
0x12c7   :  { %v1734_v38 = vsel %vm371_vm3, %v1683_v36, -inf }
0x12c8   :  { %v1728_v39 = vpop.f32.mrf.mxu1  ;;  %1735 = vmax.xlane.f32.xlu0 %v1734_v38  ;;  %v1685_v40 = vpop.f32.mrf.mxu0 }
0x12c9   :  { %v1729_v42 = vadd.f32 %v4234_v41, %v1728_v39 }
0x12ca   :  { %v3353_v43 = vpop.f32.mrf.mxu0  ;;  %v3358_v45 = vpop.f32.mrf.mxu1 }
0x12cb   :  { %v1737_v46 = vsel %vm371_vm3, %v1729_v42, -inf }
0x12cc   :  { %1738 = vmax.xlane.f32.xlu1 %v1737_v46  ;;  %v1731_v47 = vpop.f32.mrf.mxu1 }
0x12ce   :  { %v3359_v50 = vpop.f32.mrf.mxu1 }
0x1351   :  { %v1736_v51 = vpop.xlane.xlu0 %1735 }
0x1352   :  { %v1740_v6 = vsub.f32 %v1683_v36, %v1736_v51 }
0x1354   :  { %v1742_v52 = vmul.f32 1.442695, %v1740_v6  ;;  %v3526_v6 = vld [vmem:[#allocation8 + $0x28] sm:$0xff]  }
0x1355   :  { %v1739_v53 = vpop.xlane.xlu1 %1738 }
0x1356   :  { %3590 = vpow2.f32 %v1742_v52  ;;  %v1741_v7 = vsub.f32 %v1729_v42, %v1739_v53  ;;  %v3527_v52 = vld [vmem:[#allocation8 + $0x20] sm:$0xff]  }
0x1358   :  { %v1744_v56 = vmul.f32 1.442695, %v1741_v7 }
0x135a   :  { %3592 = vpow2.f32 %v1744_v56 }
0x1363   :  { %v3591_v57 = vpop.eup %3590 }
0x1364   :  { %v1746_v59 = vsel %vm371_vm3, %v3591_v57, 0.0 }
0x1365   :  { %1747 = vadd.xlane.f32.xlu0 %v1746_v59 }
0x1367   :  { %v3593_v54 = vpop.eup %3592 }
0x1368   :  { %v1749_v60 = vsel %vm371_vm3, %v3593_v54, 0.0 }
0x1369   :  { %1750 = vadd.xlane.f32.xlu1 %v1749_v60 }
0x13ee   :  { %v1748_v61 = vpop.xlane.xlu0 %1747 }
0x13ef   :  { %3594 = vrcp.f32 %v1748_v61 }
0x13f2   :  { %v1751_v62 = vpop.xlane.xlu1 %1750 }
0x13f3   :  { %3596 = vrcp.f32 %v1751_v62  ;;  %v1951_v62 = vrot.slane %v4254_v25, %v3934_v13 }
0x13fc   :  { %v3595_v63 = vpop.eup %3594 }
0x13fd   :  { %v1754_v2 = vmul.f32 %v3595_v63, %v3591_v57 }
0x13ff   :  { %v1756_v3 = vpack.c.bf16 %v1754_v2, %v1754_v2 }
0x1400   :  { %v3597_v4 = vpop.eup %3596 }
0x1401   :  { %3363 = vmatmul.mubr.msk.bf16.vlgmr.msra.gmra.mxu0 %vm371_vm3, %v1756_v3  ;;  %v1755_v5 = vmul.f32 %v3597_v4, %v3593_v54  ;;  %v1957_v4 = vrot.slane %v4254_v25, %v3952_v32 }
0x1402   :  { %3376 = vmatprep.mubr.msk.bf16.mxu0 %vm3795_vm1, %v3794_v1  ;;  %3373 = vmatpush3.bf16.msra.mxu0 %v3524_v9 }
0x1403   :  { %v1757_v8 = vpack.c.bf16 %v1755_v5, %v1755_v5  ;;  %3374 = vmatprep.subr.bf16.mxu0 %v3794_v1 }
0x1405   :  { %3369 = vmatmul.mubr.msk.bf16.vlgmr.msra.gmra.mxu1 %vm371_vm3, %v1757_v8 }
0x1406   :  { %3384 = vmatprep.mubr.msk.bf16.mxu1 %vm3795_vm1, %v3794_v1  ;;  %3375 = vmatpush3.bf16.msra.mxu0 %v3525_v10 }
0x1407   :  { %3388 = vmatprep.subr.bf16.mxu0 %v3794_v1  ;;  %3381 = vmatpush3.bf16.msra.mxu1 %v3526_v6 }
0x1408   :  { %3382 = vmatprep.subr.bf16.mxu1 %v3794_v1 }
0x140b   :  { %3383 = vmatpush3.bf16.msra.mxu1 %v3527_v52 }
0x14c1   :  { %v1800_v11 = vpop.f32.mrf.mxu0 }
0x14c3   :  { %v3364_v14 = vpop.f32.mrf.mxu0 }
0x14c4   :  { %v3529_v14 = vld [vmem:[%s4453_s6 + $0x50] sm:$0xff]  }
0x14c5   :  { %v1803_v15 = vpop.f32.mrf.mxu0  ;;  %v1846_v16 = vpop.f32.mrf.mxu1 }
0x14c6   :  { %v1854_v18 = vpack.c.bf16 %v1846_v16, %v1800_v11  ;;  %v3528_v11 = vld [vmem:[%s4453_s6 + $0x58] sm:$0xff]   ;;  %v3530_v15 = vld [vmem:[%s4453_s6 + $0x48] sm:$0xff]   ;;  %v3066_v16 = vld [vmem:[%s4455_s8 + $0x2] ss:$0 sm:$0xff] }
0x14c7   :  { %v3365_v19 = vpop.f32.mrf.mxu0  ;;  %v3370_v20 = vpop.f32.mrf.mxu1 }
0x14c8   :  { %3377 = vmatmul.mubr.msk.bf16.vlgmr.msra.gmra.mxu0 %vm113_vm0, %v1854_v18 }
0x14c9   :  { %v1849_v21 = vpop.f32.mrf.mxu1  ;;  %3396 = vmatprep.mubr.msk.bf16.mxu0 %vm3795_vm1, %v3794_v1  ;;  %3389 = vmatpush3.bf16.msra.mxu0 %v3528_v11 }
0x14ca   :  { %3390 = vmatprep.subr.bf16.mxu0 %v3794_v1 }
0x14cb   :  { %v3371_v24 = vpop.f32.mrf.mxu1 }
0x14cd   :  { %3391 = vmatpush3.bf16.msra.mxu0 %v3529_v14 }
0x14ce   :  { %3392 = vmatprep.subr.bf16.mxu0 %v3794_v1 }
0x14d1   :  { %3393 = vmatpush3.bf16.msra.mxu0 %v3530_v15  ;;  %v3532_v15 = vld [vmem:[%s4449_s2 + $0xa8] ss:$12 sps:$4 sm:$0xff]  }
0x14d2   :  { %3394 = vmatprep.subr.bf16.mxu0 %v3794_v1 }
0x1588   :  { %v1913_v44 = vpop.f32.mrf.mxu0 }
0x1589   :  { %v1914_v27 = vadd.f32 %v1913_v44, %v1863_v26 }
0x158a   :  { %v3378_v28 = vpop.f32.mrf.mxu0 }
0x158b   :  { %v1920_v29 = vadd.f32 %v1914_v27, %v4183_v55 }
0x158c   :  { %v1916_v48 = vpop.f32.mrf.mxu0 }
0x158d   :  { %v1917_v33 = vadd.f32 %v1916_v48, %v1863_v26  ;;  %v1922_v34 = vsel %vm113_vm0, %v1920_v29, 0.0 }
0x158e   :  { %1923 = vadd.xlane.f32.xlu0 %v1922_v34  ;;  %v3379_v12 = vpop.f32.mrf.mxu0 }
0x158f   :  { %v1921_v36 = vadd.f32 %v1917_v33, %v4187_v58 }
0x1591   :  { %v1925_v37 = vsel %vm113_vm0, %v1921_v36, 0.0 }
0x1592   :  { %1926 = vadd.xlane.f32.xlu1 %v1925_v37 }
0x1617   :  { %v1924_v38 = vpop.xlane.xlu0 %1923 }
0x1618   :  { %v1928_v39 = vmul.f32 0.03125, %v1924_v38 }
0x161a   :  { %v1930_v40 = vsub.f32 %v1920_v29, %v1928_v39 }
0x161b   :  { %v1927_v42 = vpop.xlane.xlu1 %1926 }
0x161c   :  { %v1929_v43 = vmul.f32 0.03125, %v1927_v42  ;;  %v1932_v45 = vmul.f32 %v1930_v40, %v1930_v40 }
0x161e   :  { %v1931_v46 = vsub.f32 %v1921_v36, %v1929_v43  ;;  %v1934_v47 = vsel %vm113_vm0, %v1932_v45, 0.0 }
0x161f   :  { %1935 = vadd.xlane.f32.xlu0 %v1934_v47 }
0x1620   :  { %v1933_v50 = vmul.f32 %v1931_v46, %v1931_v46 }
0x1622   :  { %v1937_v51 = vsel %vm113_vm0, %v1933_v50, 0.0 }
0x1623   :  { %1938 = vadd.xlane.f32.xlu1 %v1937_v51  ;;  %v2061_v51 = vrot.slane %v4254_v25, %v4029_v49 }
0x16a8   :  { %v1936_v53 = vpop.xlane.xlu0 %1935 }
0x16a9   :  { %v1940_v7 = vmul.f32 0.03125, %v1936_v53 }
0x16ab   :  { %v1942_v56 = vadd.f32 1e-12, %v1940_v7 }
0x16ac   :  { %v1939_v57 = vpop.xlane.xlu1 %1938 }
0x16ad   :  { %3598 = vrsqrt.f32 %v1942_v56  ;;  %v1941_v59 = vmul.f32 0.03125, %v1939_v57 }
0x16af   :  { %v1943_v54 = vadd.f32 1e-12, %v1941_v59 }
0x16b1   :  { %3600 = vrsqrt.f32 %v1943_v54 }
0x16ba   :  { %v3599_v60 = vpop.eup %3598 }
0x16bb   :  { %v1946_v61 = vmul.f32 %v3599_v60, %v1930_v40 }
0x16bd   :  { %v1952_v3 = vmul.f32 %v1951_v62, %v1946_v61 }
0x16be   :  { %v3601_v63 = vpop.eup %3600 }
0x16bf   :  { %v1947_v2 = vmul.f32 %v3601_v63, %v1931_v46  ;;  %v1958_v8 = vadd.f32 %v1957_v4, %v1952_v3 }
0x16c1   :  { %v1953_v5 = vmul.f32 %v1951_v62, %v1947_v2 }
0x16c3   :  { %v1959_v9 = vadd.f32 %v1957_v4, %v1953_v5 }
0x16c5   :  { %v1960_v10 = vpack.c.bf16 %v1959_v9, %v1958_v8 }
0x16c7   :  { %3385 = vmatmul.mubr.msk.bf16.vlgmr.msra.gmra.mxu1 %vm113_vm0, %v1960_v10 }
0x16c8   :  { %2268 = vmatprep.mubr.bf16.mxu1 %v3793_v0  ;;  %v3531_v0 = vld [vmem:[%s4453_s6 + $0x40] sm:$0xff]  }
0x16c9   :  { %3395 = vmatpush3.bf16.msra.mxu0 %v3531_v0  ;;  %v3537_v0 = vld [vmem:[%s4449_s2 + $0x94] ss:$12 sps:$4 sm:$0xff]  }
0x16ca   :  { %3408 = vmatprep.subr.bf16.mxu0 %v3794_v1 }
0x1787   :  { %v2023_v18 = vpop.f32.mrf.mxu1 }
0x1788   :  { %v2024_v19 = vadd.f32 %v3066_v16, %v2023_v18 }
0x1789   :  { %v3386_v20 = vpop.f32.mrf.mxu1 }
0x178a   :  { %v2032_v21 = vmul.f32 0.044715, %v2024_v19  ;;  %v2030_v42 = vmul.f32 0.5, %v2024_v19 }
0x178b   :  { %v2026_v24 = vpop.f32.mrf.mxu1 }
0x178c   :  { %v2034_v26 = vmul.f32 %v2032_v21, %v2024_v19  ;;  %v2027_v44 = vadd.f32 %v3066_v16, %v2026_v24  ;;  %v3535_v16 = vld [vmem:[%s4449_s2 + $0x90] ss:$12 sps:$4 sm:$0xff]  }
0x178d   :  { %v3387_v27 = vpop.f32.mrf.mxu1 }
0x178e   :  { %v2036_v28 = vmul.f32 %v2034_v26, %v2024_v19  ;;  %v2033_v29 = vmul.f32 0.044715, %v2027_v44  ;;  %v2031_v43 = vmul.f32 0.5, %v2027_v44 }
0x1790   :  { %v2038_v48 = vadd.f32 %v2036_v28, %v2024_v19  ;;  %v2035_v33 = vmul.f32 %v2033_v29, %v2027_v44  ;;  %v2167_v28 = vrot.slane %v4254_v25, %v4054_v23 }
0x1792   :  { %v2040_v34 = vmul.f32 0.7978846, %v2038_v48  ;;  %v2037_v12 = vmul.f32 %v2035_v33, %v2027_v44 }
0x1794   :  { %3602 = vtanh.f32 %v2040_v34  ;;  %v2039_v36 = vadd.f32 %v2037_v12, %v2027_v44  ;;  %v2161_v44 = vrot.slane %v4254_v25, %v4051_v22 }
0x1796   :  { %v2041_v37 = vmul.f32 0.7978846, %v2039_v36 }
0x1798   :  { %3604 = vtanh.f32 %v2041_v37 }
0x17a1   :  { %v3603_v38 = vpop.eup %3602 }
0x17a2   :  { %v2044_v39 = vadd.f32 1.0, %v3603_v38  ;;  %v3538_v38 = vld [vmem:[%s4449_s2 + $0xb0] ss:$12 sps:$4 sm:$0xff]  }
0x17a4   :  { %v2046_v46 = vmul.f32 %v2044_v39, %v2030_v42  ;;  %v3539_v39 = vld [vmem:[%s4449_s2 + $0x98] ss:$12 sps:$4 sm:$0xff]  }
0x17a5   :  { %v3605_v40 = vpop.eup %3604 }
0x17a6   :  { %v2045_v45 = vadd.f32 1.0, %v3605_v40  ;;  %v2184_v40 = vld [vmem:[#allocation5 + $0x9] sm:$0x7] }
0x17a7   :  { %v2193_v42 = vrot.slane %v2184_v40, %v3934_v13 }
0x17a8   :  { %v2047_v47 = vmul.f32 %v2045_v45, %v2031_v43 }
0x17aa   :  { %v2048_v50 = vpack.c.bf16 %v2047_v47, %v2046_v46 }
0x17ac   :  { %3397 = vmatmul.mubr.msk.bf16.vlgmr.msra.gmra.mxu0 %vm721_vm4, %v2048_v50  ;;  %v2189_v50 = vrot.slane %v2184_v40, %v3938_v17 }
0x17ad   :  { %3410 = vmatprep.mubr.msk.bf16.mxu0 %vm3795_vm1, %v3794_v1 }
0x186c   :  { %v2123_v6 = vpop.f32.mrf.mxu0 }
0x186d   :  { %v2124_v52 = vadd.f32 %v2123_v6, %v2061_v51  ;;  %v2197_v6 = vrot.slane %v2184_v40, %v3952_v32 }
0x186e   :  { %v3398_v53 = vpop.f32.mrf.mxu0 }
0x186f   :  { %v2130_v7 = vadd.f32 %v2124_v52, %v1958_v8 }
0x1870   :  { %v2126_v56 = vpop.f32.mrf.mxu0 }
0x1871   :  { %v2127_v57 = vadd.f32 %v2126_v56, %v2061_v51  ;;  %v2132_v59 = vsel %vm113_vm0, %v2130_v7, 0.0 }
0x1872   :  { %2133 = vadd.xlane.f32.xlu0 %v2132_v59  ;;  %v3399_v54 = vpop.f32.mrf.mxu0 }
0x1873   :  { %v2131_v60 = vadd.f32 %v2127_v57, %v1959_v9  ;;  %v3534_v9 = vld [vmem:[%s4449_s2 + $0xac] ss:$12 sps:$4 sm:$0xff]  }
0x1874   :  { %2248 = vmatprep.subr.bf16.mxu1 %v3534_v9 }
0x1875   :  { %v2135_v61 = vsel %vm113_vm0, %v2131_v60, 0.0  ;;  %2249 = vmatpush1.bf16.msra.mxu1 %v3532_v15 }
0x1876   :  { %2136 = vadd.xlane.f32.xlu1 %v2135_v61  ;;  %2250 = vmatprep.subr.bf16.mxu1 %v3537_v0 }
0x1879   :  { %2251 = vmatpush1.bf16.msra.mxu1 %v3535_v16 }
0x187a   :  { %3400 = vmatprep.subr.bf16.mxu1 %v3794_v1 }
0x18fb   :  { %v2134_v62 = vpop.xlane.xlu0 %2133 }
0x18fc   :  { %v2138_v63 = vmul.f32 0.03125, %v2134_v62 }
0x18fe   :  { %v2140_v2 = vsub.f32 %v2130_v7, %v2138_v63 }
0x18ff   :  { %v2137_v3 = vpop.xlane.xlu1 %2136 }
0x1900   :  { %v2139_v4 = vmul.f32 0.03125, %v2137_v3  ;;  %v2142_v5 = vmul.f32 %v2140_v2, %v2140_v2 }
0x1902   :  { %v2141_v10 = vsub.f32 %v2131_v60, %v2139_v4  ;;  %v2144_v11 = vsel %vm113_vm0, %v2142_v5, 0.0 }
0x1903   :  { %2145 = vadd.xlane.f32.xlu0 %v2144_v11 }
0x1904   :  { %v2143_v8 = vmul.f32 %v2141_v10, %v2141_v10 }
0x1906   :  { %v2147_v14 = vsel %vm113_vm0, %v2143_v8, 0.0 }
0x1907   :  { %2148 = vadd.xlane.f32.xlu1 %v2147_v14 }
0x198c   :  { %v2146_v18 = vpop.xlane.xlu0 %2145 }
0x198d   :  { %v2150_v19 = vmul.f32 0.03125, %v2146_v18 }
0x198f   :  { %v2152_v20 = vadd.f32 1e-12, %v2150_v19 }
0x1990   :  { %v2149_v21 = vpop.xlane.xlu1 %2148 }
0x1991   :  { %3606 = vrsqrt.f32 %v2152_v20  ;;  %v2151_v24 = vmul.f32 0.03125, %v2149_v21 }
0x1993   :  { %v2153_v26 = vadd.f32 1e-12, %v2151_v24 }
0x1995   :  { %3608 = vrsqrt.f32 %v2153_v26 }
0x199e   :  { %v3607_v27 = vpop.eup %3606 }
0x199f   :  { %v2156_v29 = vmul.f32 %v3607_v27, %v2140_v2 }
0x19a1   :  { %v2162_v48 = vmul.f32 %v2161_v44, %v2156_v29 }
0x19a2   :  { %v3609_v33 = vpop.eup %3608 }
0x19a3   :  { %v4316_v34 = vadd.f32 %v2167_v28, %v2162_v48  ;;  %v2157_v12 = vmul.f32 %v3609_v33, %v2141_v10 }
0x19a5   :  { %2171 = vst.msk [vmem:[#allocation11 + $0x30] sm:$0xff] %vm113_vm0, %v4316_v34  ;;  %v2163_v36 = vmul.f32 %v2161_v44, %v2157_v12 }
0x19a7   :  { %v4320_v37 = vadd.f32 %v2167_v28, %v2163_v36 }
0x19a9   :  { %2172 = vst.msk [vmem:[#allocation11 + $0x38] sm:$0xff] %vm113_vm0, %v4320_v37  ;;  %v2173_v25 = vpack.c.bf16 %v4320_v37, %v4316_v34 }
0x19ab   :  { %3097 = vmatmul.mubr.msk.bf16.vlgmr.msra.gmra.mxu1 %vm113_vm0, %v2173_v25 }
0x19ac   :  { %3401 = vmatpush3.bf16.msra.mxu1 %v3538_v38  ;;  %3404 = vmatprep.mubr.msk.bf16.mxu1 %vm3795_vm1, %v3794_v1 }
0x19ad   :  { %3402 = vmatprep.subr.bf16.mxu1 %v3794_v1 }
0x19b0   :  { %3403 = vmatpush3.bf16.msra.mxu1 %v3539_v39 }
0x19b1   :  { %3414 = vmatprep.subr.bf16.mxu1 %v3794_v1 }
0x19b3   :  { %3405 = vmatmul.mubr.msk.bf16.vlgmr.msra.gmra.mxu1 %vm113_vm0, %v2173_v25 }
0x19b4   :  { %3416 = vmatprep.mubr.msk.bf16.mxu1 %vm3795_vm1, %v3794_v1 }
0x1a6b   :  { %v2270_v43 = vpop.f32.mrf.mxu1 }
0x1a6c   :  { %v2271_v57 = vadd.f32 %v2270_v43, %v2189_v50 }
0x1a6d   :  { %v2272_v45 = vpop.f32.mrf.mxu1 }
0x1a6e   :  { %v2273_v46 = vadd.f32 %v2272_v45, %v2193_v42  ;;  %v2320_v2 = vpack.c.bf16 %v2271_v57, %v2271_v57 }
0x1a6f   :  { %v2274_v47 = vpop.f32.mrf.mxu1 }
0x1a70   :  { %v2322_v51 = vpack.c.bf16 %v2273_v46, %v2273_v46  ;;  %v2275_v3 = vadd.f32 %v2274_v47, %v2189_v50 }
0x1a71   :  { %v2276_v52 = vpop.f32.mrf.mxu1 }
0x1a72   :  { %v2328_v53 = vsel %vm113_vm0, %v2322_v51, 0  ;;  %v2277_v7 = vadd.f32 %v2276_v52, %v2193_v42  ;;  %v2321_v8 = vpack.c.bf16 %v2275_v3, %v2275_v3  ;;  %v3540_v51 = vld [vmem:[#allocation7 + $0x38] sm:$0xff]  }
0x1a73   :  { %v2313_v56 = vpop.f32.mrf.mxu1  ;;  %3409 = vmatpush3.bf16.xpose.msra.mxu0 %v2328_v53 }
0x1a74   :  { %v2323_v59 = vpack.c.bf16 %v2277_v7, %v2277_v7  ;;  %v2314_v54 = vadd.f32 %v2313_v56, %v2197_v6  ;;  %3420 = vmatprep.subr.bf16.mxu0 %v3794_v1 }
0x1a75   :  { %v3406_v60 = vpop.f32.mrf.mxu1 }
0x1a76   :  { %v2374_v61 = vsel %vm113_vm0, %v2323_v59, 0  ;;  %v2440_v62 = vpack.c.bf16 %v2314_v54, %v2314_v54 }
0x1a77   :  { %v2316_v63 = vpop.f32.mrf.mxu1  ;;  %3415 = vmatpush3.bf16.xpose.msra.mxu1 %v2374_v61 }
0x1a78   :  { %v2317_v4 = vadd.f32 %v2316_v63, %v2197_v6  ;;  %3426 = vmatprep.subr.bf16.mxu1 %v3794_v1  ;;  %v2446_v10 = vsel %vm401_vm2, %v2440_v62, 0  ;;  %v3541_v6 = vld [vmem:[#allocation7 + $0x30] sm:$0xff]   ;;  %v4377_v62 = vld [vmem:[%s4454_s7 + $0x18] sm:$0x3f] }
0x1a79   :  { %v3407_v5 = vpop.f32.mrf.mxu1  ;;  %v2545_v63 = vrot.slane %v4377_v62, %v3938_v17 }
0x1a7a   :  { %v2441_v11 = vpack.c.bf16 %v2317_v4, %v2317_v4  ;;  %3411 = vmatmul.mubr.msk.bf16.vlgmr.msra.gmra.mxu0 %vm113_vm0, %v2320_v2 }
0x1a7b   :  { %3421 = vmatpush3.bf16.msra.mxu0 %v2446_v10  ;;  %3422 = vmatprep.mubr.msk.bf16.mxu0 %vm3795_vm1, %v3794_v1 }
0x1a7c   :  { %3432 = vmatprep.subr.bf16.mxu0 %v3794_v1  ;;  %v2492_v14 = vsel %vm401_vm2, %v2441_v11, 0 }
0x1a7e   :  { %3417 = vmatmul.mubr.msk.bf16.vlgmr.msra.gmra.mxu1 %vm113_vm0, %v2321_v8 }
0x1a7f   :  { %3427 = vmatpush3.bf16.msra.mxu1 %v2492_v14  ;;  %3428 = vmatprep.mubr.msk.bf16.mxu1 %vm3795_vm1, %v3794_v1 }
0x1a80   :  { %3440 = vmatprep.subr.bf16.mxu1 %v3794_v1 }
0x1b3a   :  { %v2364_v9 = vpop.f32.mrf.mxu0 }
0x1b3b   :  { %v2365_v15 = vadd.f32 %v4227_v30, %v2364_v9 }
0x1b3c   :  { %v3412_v0 = vpop.f32.mrf.mxu0 }
0x1b3d   :  { %v2416_v16 = vsel %vm371_vm3, %v2365_v15, -inf }
0x1b3e   :  { %v2410_v18 = vpop.f32.mrf.mxu1  ;;  %2417 = vmax.xlane.f32.xlu0 %v2416_v16  ;;  %v2367_v19 = vpop.f32.mrf.mxu0 }
0x1b3f   :  { %v2411_v20 = vadd.f32 %v4234_v41, %v2410_v18 }
0x1b40   :  { %v3413_v21 = vpop.f32.mrf.mxu0  ;;  %v3418_v24 = vpop.f32.mrf.mxu1 }
0x1b41   :  { %v2419_v26 = vsel %vm371_vm3, %v2411_v20, -inf }
0x1b42   :  { %2420 = vmax.xlane.f32.xlu1 %v2419_v26  ;;  %v2413_v44 = vpop.f32.mrf.mxu1 }
0x1b44   :  { %v3419_v27 = vpop.f32.mrf.mxu1 }
0x1b45   :  { %v3542_v27 = vld [vmem:[#allocation8 + $0x38] sm:$0xff]  }
0x1bc7   :  { %v2418_v28 = vpop.xlane.xlu0 %2417 }
0x1bc8   :  { %v2422_v29 = vsub.f32 %v2365_v15, %v2418_v28  ;;  %v3543_v28 = vld [vmem:[#allocation8 + $0x30] sm:$0xff]  }
0x1bca   :  { %v2424_v48 = vmul.f32 1.442695, %v2422_v29 }
0x1bcb   :  { %v2421_v33 = vpop.xlane.xlu1 %2420 }
0x1bcc   :  { %3610 = vpow2.f32 %v2424_v48  ;;  %v2423_v30 = vsub.f32 %v2411_v20, %v2421_v33 }
0x1bce   :  { %v2426_v12 = vmul.f32 1.442695, %v2423_v30 }
0x1bd0   :  { %3612 = vpow2.f32 %v2426_v12 }
0x1bd9   :  { %v3611_v36 = vpop.eup %3610 }
0x1bda   :  { %v2428_v38 = vsel %vm371_vm3, %v3611_v36, 0.0 }
0x1bdb   :  { %2429 = vadd.xlane.f32.xlu0 %v2428_v38 }
0x1bdd   :  { %v3613_v41 = vpop.eup %3612 }
0x1bde   :  { %v2431_v25 = vsel %vm371_vm3, %v3613_v41, 0.0 }
0x1bdf   :  { %2432 = vadd.xlane.f32.xlu1 %v2431_v25  ;;  %v2633_v25 = vrot.slane %v4377_v62, %v3934_v13  ;;  %v3545_v13 = vld [vmem:[%s4453_s6 + $0x70] sm:$0xff]  }
0x1c64   :  { %v2430_v39 = vpop.xlane.xlu0 %2429 }
0x1c65   :  { %3614 = vrcp.f32 %v2430_v39 }
0x1c68   :  { %v2433_v40 = vpop.xlane.xlu1 %2432 }
0x1c69   :  { %3616 = vrcp.f32 %v2433_v40 }
0x1c72   :  { %v3615_v42 = vpop.eup %3614 }
0x1c73   :  { %v2436_v43 = vmul.f32 %v3615_v42, %v3611_v36 }
0x1c75   :  { %v2438_v45 = vpack.c.bf16 %v2436_v43, %v2436_v43  ;;  %v2639_v43 = vrot.slane %v4377_v62, %v3952_v32  ;;  %v3546_v32 = vld [vmem:[%s4453_s6 + $0x68] sm:$0xff]  }
0x1c76   :  { %v3617_v46 = vpop.eup %3616 }
0x1c77   :  { %3423 = vmatmul.mubr.msk.bf16.vlgmr.msra.gmra.mxu0 %vm371_vm3, %v2438_v45  ;;  %v2437_v47 = vmul.f32 %v3617_v46, %v3613_v41 }
0x1c78   :  { %3436 = vmatprep.mubr.msk.bf16.mxu0 %vm3795_vm1, %v3794_v1  ;;  %3433 = vmatpush3.bf16.msra.mxu0 %v3540_v51  ;;  %v3544_v51 = vld [vmem:[%s4453_s6 + $0x78] sm:$0xff]  }
0x1c79   :  { %v2439_v50 = vpack.c.bf16 %v2437_v47, %v2437_v47  ;;  %3434 = vmatprep.subr.bf16.mxu0 %v3794_v1 }
0x1c7b   :  { %3429 = vmatmul.mubr.msk.bf16.vlgmr.msra.gmra.mxu1 %vm371_vm3, %v2439_v50 }
0x1c7c   :  { %3444 = vmatprep.mubr.msk.bf16.mxu1 %vm3795_vm1, %v3794_v1  ;;  %3435 = vmatpush3.bf16.msra.mxu0 %v3541_v6  ;;  %v3547_v6 = vld [vmem:[%s4453_s6 + $0x60] sm:$0xff]   ;;  %s3796_s6 = smov [#allocation11]  }
0x1c7d   :  { %3448 = vmatprep.subr.bf16.mxu0 %v3794_v1  ;;  %3441 = vmatpush3.bf16.msra.mxu1 %v3542_v27 }
0x1c7e   :  { %3442 = vmatprep.subr.bf16.mxu1 %v3794_v1 }
0x1c81   :  { %3443 = vmatpush3.bf16.msra.mxu1 %v3543_v28 }
0x1c82   :  { %3460 = vmatprep.subr.bf16.mxu1 %v3794_v1 }
0x1d37   :  { %v2482_v52 = vpop.f32.mrf.mxu0 }
0x1d39   :  { %v3424_v53 = vpop.f32.mrf.mxu0 }
0x1d3b   :  { %v2485_v7 = vpop.f32.mrf.mxu0  ;;  %v2528_v56 = vpop.f32.mrf.mxu1 }
0x1d3c   :  { %v2536_v57 = vpack.c.bf16 %v2528_v56, %v2482_v52  ;;  %v3108_v52 = vld [vmem:[%s4455_s8 + $0x3] ss:$0 sm:$0xff]  ;;  %s2945_s8 = sshll.u32 %s3796_s6, 4  ;;  %s2946_s8 = int_to_ptr.vmem [resolvable:$true] %s2945_s8 }
0x1d3d   :  { %v3425_v59 = vpop.f32.mrf.mxu0  ;;  %v3430_v54 = vpop.f32.mrf.mxu1  ;;  %s3732_s27 = scalar_lea.vmem %s2946_s8, 1280  ;;  %p3737_p12 = scmp.lt.s32.totalorder %s2946_s8, %s2946_s8 }
0x1d3e   :  { %3437 = vmatmul.mubr.msk.bf16.vlgmr.msra.gmra.mxu0 %vm113_vm0, %v2536_v57  ;;  %p3733_p11 = scmp.ne.s32.totalorder %s2946_s8, %s3732_s27  ;;  %p3738_p13 = scmp.lt.s32.totalorder %s3732_s27, %s3732_s27 }
0x1d3f   :  { %v2531_v60 = vpop.f32.mrf.mxu1  ;;  %3456 = vmatprep.mubr.msk.bf16.mxu0 %vm3795_vm1, %v3794_v1  ;;  %3449 = vmatpush3.bf16.msra.mxu0 %v3544_v51 }
0x1d40   :  { %3450 = vmatprep.subr.bf16.mxu0 %v3794_v1  ;;  %p3739_p0 = por %p3738_p13, %p3737_p12 }
0x1d41   :  { %v3431_v61 = vpop.f32.mrf.mxu1 }
0x1d42   :  { %p3740_p1 = pnand %p3739_p0, %p3733_p11 }
0x1d43   :  { %3451 = vmatpush3.bf16.msra.mxu0 %v3545_v13 }
0x1d44   :  { %3452 = vmatprep.subr.bf16.mxu0 %v3794_v1 }
0x1d47   :  { %3453 = vmatpush3.bf16.msra.mxu0 %v3546_v32 }
0x1d48   :  { %3454 = vmatprep.subr.bf16.mxu0 %v3794_v1 }
0x1d4b   :  { %3455 = vmatpush3.bf16.msra.mxu0 %v3547_v6 }
0x1dfe   :  { %v2595_v2 = vpop.f32.mrf.mxu0 }
0x1dff   :  { %v2596_v3 = vadd.f32 %v2595_v2, %v2545_v63 }
0x1e00   :  { %v3438_v4 = vpop.f32.mrf.mxu0 }
0x1e01   :  { %v2602_v5 = vadd.f32 %v2596_v3, %v4316_v34 }
0x1e02   :  { %v2598_v10 = vpop.f32.mrf.mxu0 }
0x1e03   :  { %v2599_v11 = vadd.f32 %v2598_v10, %v2545_v63  ;;  %v2604_v8 = vsel %vm113_vm0, %v2602_v5, 0.0 }
0x1e04   :  { %2605 = vadd.xlane.f32.xlu0 %v2604_v8  ;;  %v3439_v14 = vpop.f32.mrf.mxu0 }
0x1e05   :  { %v2603_v9 = vadd.f32 %v2599_v11, %v4320_v37 }
0x1e07   :  { %v2607_v15 = vsel %vm113_vm0, %v2603_v9, 0.0 }
0x1e08   :  { %2608 = vadd.xlane.f32.xlu1 %v2607_v15 }
0x1e8d   :  { %v2606_v0 = vpop.xlane.xlu0 %2605 }
0x1e8e   :  { %v2610_v16 = vmul.f32 0.03125, %v2606_v0 }
0x1e90   :  { %v2612_v18 = vsub.f32 %v2602_v5, %v2610_v16 }
0x1e91   :  { %v2609_v17 = vpop.xlane.xlu1 %2608 }
0x1e92   :  { %v2611_v19 = vmul.f32 0.03125, %v2609_v17  ;;  %v2614_v20 = vmul.f32 %v2612_v18, %v2612_v18 }
0x1e94   :  { %v2613_v21 = vsub.f32 %v2603_v9, %v2611_v19  ;;  %v2616_v24 = vsel %vm113_vm0, %v2614_v20, 0.0 }
0x1e95   :  { %2617 = vadd.xlane.f32.xlu0 %v2616_v24 }
0x1e96   :  { %v2615_v26 = vmul.f32 %v2613_v21, %v2613_v21 }
0x1e98   :  { %v2619_v44 = vsel %vm113_vm0, %v2615_v26, 0.0 }
0x1e99   :  { %2620 = vadd.xlane.f32.xlu1 %v2619_v44 }
0x1f1e   :  { %v2618_v29 = vpop.xlane.xlu0 %2617 }
0x1f1f   :  { %v2622_v48 = vmul.f32 0.03125, %v2618_v29 }
0x1f21   :  { %v2624_v33 = vadd.f32 1e-12, %v2622_v48 }
0x1f22   :  { %v2621_v30 = vpop.xlane.xlu1 %2620 }
0x1f23   :  { %3618 = vrsqrt.f32 %v2624_v33  ;;  %v2623_v12 = vmul.f32 0.03125, %v2621_v30 }
0x1f25   :  { %v2625_v36 = vadd.f32 1e-12, %v2623_v12 }
0x1f27   :  { %3620 = vrsqrt.f32 %v2625_v36 }
0x1f30   :  { %v3619_v38 = vpop.eup %3618 }
0x1f31   :  { %v2628_v41 = vmul.f32 %v3619_v38, %v2612_v18 }
0x1f33   :  { %v2634_v42 = vmul.f32 %v2633_v25, %v2628_v41 }
0x1f34   :  { %v3621_v39 = vpop.eup %3620 }
0x1f35   :  { %v2629_v40 = vmul.f32 %v3621_v39, %v2613_v21  ;;  %v2640_v46 = vadd.f32 %v2639_v43, %v2634_v42  ;;  %v2743_v21 = vrot.slane %v4377_v62, %v4029_v49 }
0x1f37   :  { %v2635_v45 = vmul.f32 %v2633_v25, %v2629_v40 }
0x1f39   :  { %v2641_v47 = vadd.f32 %v2639_v43, %v2635_v45 }
0x1f3b   :  { %v2642_v50 = vpack.c.bf16 %v2641_v47, %v2640_v46 }
0x1f3d   :  { %3445 = vmatmul.mubr.msk.bf16.vlgmr.msra.gmra.mxu1 %vm113_vm0, %v2642_v50 }
0x1f3e   :  { %3464 = vmatprep.mubr.msk.bf16.mxu1 %vm3795_vm1, %v3794_v1 }
0x1ffd   :  { %v2705_v53 = vpop.f32.mrf.mxu1 }
0x1ffe   :  { %v2706_v7 = vadd.f32 %v3108_v52, %v2705_v53  ;;  %v2843_v53 = vrot.slane %v4377_v62, %v4051_v22  ;;  %v2856_v22 = vadd.f32 %v4187_v58, %v4064_v35 }
0x1fff   :  { %v3446_v56 = vpop.f32.mrf.mxu1 }
0x2000   :  { %v2714_v57 = vmul.f32 0.044715, %v2706_v7  ;;  %v2712_v0 = vmul.f32 0.5, %v2706_v7  ;;  %v2849_v56 = vrot.slane %v4377_v62, %v4054_v23  ;;  %v2858_v23 = vadd.f32 %v2856_v22, %v4320_v37 }
0x2001   :  { %v2708_v59 = vpop.f32.mrf.mxu1 }
0x2002   :  { %v2716_v54 = vmul.f32 %v2714_v57, %v2706_v7  ;;  %v2709_v60 = vadd.f32 %v3108_v52, %v2708_v59 }
0x2003   :  { %v3447_v61 = vpop.f32.mrf.mxu1 }
0x2004   :  { %v2718_v63 = vmul.f32 %v2716_v54, %v2706_v7  ;;  %v2715_v2 = vmul.f32 0.044715, %v2709_v60  ;;  %v2713_v16 = vmul.f32 0.5, %v2709_v60 }
0x2006   :  { %v2720_v3 = vadd.f32 %v2718_v63, %v2706_v7  ;;  %v2717_v4 = vmul.f32 %v2715_v2, %v2709_v60 }
0x2008   :  { %v2722_v5 = vmul.f32 0.7978846, %v2720_v3  ;;  %v2719_v10 = vmul.f32 %v2717_v4, %v2709_v60 }
0x200a   :  { %3622 = vtanh.f32 %v2722_v5  ;;  %v2721_v11 = vadd.f32 %v2719_v10, %v2709_v60 }
0x200c   :  { %v2723_v8 = vmul.f32 0.7978846, %v2721_v11 }
0x200e   :  { %3624 = vtanh.f32 %v2723_v8 }
0x2017   :  { %v3623_v14 = vpop.eup %3622 }
0x2018   :  { %v2726_v9 = vadd.f32 1.0, %v3623_v14 }
0x201a   :  { %v2728_v17 = vmul.f32 %v2726_v9, %v2712_v0 }
0x201b   :  { %v3625_v15 = vpop.eup %3624 }
0x201c   :  { %v2727_v18 = vadd.f32 1.0, %v3625_v15 }
0x201e   :  { %v2729_v19 = vmul.f32 %v2727_v18, %v2713_v16 }
0x2020   :  { %v2730_v20 = vpack.c.bf16 %v2729_v19, %v2728_v17 }
0x2022   :  { %3457 = vmatmul.mubr.msk.bf16.vlgmr.msra.gmra.mxu0 %vm721_vm4, %v2730_v20 }
0x20e2   :  { %v2805_v24 = vpop.f32.mrf.mxu0 }
0x20e3   :  { %v2806_v26 = vadd.f32 %v2805_v24, %v2743_v21 }
0x20e4   :  { %v3458_v44 = vpop.f32.mrf.mxu0 }
0x20e5   :  { %v2812_v27 = vadd.f32 %v2806_v26, %v2640_v46  ;;  %v3548_v46 = vld [vmem:[#allocation10 + $0x8] sm:$0xff]  }
0x20e6   :  { %v2808_v28 = vpop.f32.mrf.mxu0  ;;  %3461 = vmatpush3.bf16.msra.mxu1 %v3548_v46 }
0x20e7   :  { %v2809_v29 = vadd.f32 %v2808_v28, %v2743_v21  ;;  %v2814_v48 = vsel %vm113_vm0, %v2812_v27, 0.0  ;;  %3462 = vmatprep.subr.bf16.mxu1 %v3794_v1  ;;  %v2855_v1 = vadd.f32 %v4183_v55, %v4060_v31 }
0x20e8   :  { %2815 = vadd.xlane.f32.xlu1 %v2814_v48  ;;  %v3459_v33 = vpop.f32.mrf.mxu0 }
0x20e9   :  { %v2813_v30 = vadd.f32 %v2809_v29, %v2641_v47  ;;  %v3549_v47 = vld [vmem:[#allocation10] sm:$0xff]   ;;  %v2857_v63 = vadd.f32 %v2855_v1, %v4316_v34 }
0x20ea   :  { %3463 = vmatpush3.bf16.msra.mxu1 %v3549_v47 }
0x20eb   :  { %v2817_v12 = vsel %vm113_vm0, %v2813_v30, 0.0 }
0x20ec   :  { %2818 = vadd.xlane.f32.xlu0 %v2817_v12 }
0x2171   :  { %v2816_v36 = vpop.xlane.xlu1 %2815 }
0x2172   :  { %v2820_v38 = vmul.f32 0.03125, %v2816_v36 }
0x2174   :  { %v2822_v41 = vsub.f32 %v2812_v27, %v2820_v38 }
0x2175   :  { %v2819_v25 = vpop.xlane.xlu0 %2818 }
0x2176   :  { %v2821_v39 = vmul.f32 0.03125, %v2819_v25  ;;  %v2824_v49 = vmul.f32 %v2822_v41, %v2822_v41 }
0x2178   :  { %v2823_v40 = vsub.f32 %v2813_v30, %v2821_v39  ;;  %v2826_v42 = vsel %vm113_vm0, %v2824_v49, 0.0 }
0x2179   :  { %2827 = vadd.xlane.f32.xlu1 %v2826_v42 }
0x217a   :  { %v2825_v43 = vmul.f32 %v2823_v40, %v2823_v40 }
0x217c   :  { %v2829_v45 = vsel %vm113_vm0, %v2825_v43, 0.0 }
0x217d   :  { %2830 = vadd.xlane.f32.xlu0 %v2829_v45 }
0x2202   :  { %v2828_v50 = vpop.xlane.xlu1 %2827 }
0x2203   :  { %v2832_v51 = vmul.f32 0.03125, %v2828_v50 }
0x2205   :  { %v2834_v13 = vadd.f32 1e-12, %v2832_v51 }
0x2206   :  { %v2831_v32 = vpop.xlane.xlu0 %2830 }
0x2207   :  { %3626 = vrsqrt.f32 %v2834_v13  ;;  %v2833_v6 = vmul.f32 0.03125, %v2831_v32 }
0x2209   :  { %v2835_v52 = vadd.f32 1e-12, %v2833_v6 }
0x220b   :  { %3628 = vrsqrt.f32 %v2835_v52 }
0x2214   :  { %v3627_v7 = vpop.eup %3626 }
0x2215   :  { %v2838_v57 = vmul.f32 %v3627_v7, %v2822_v41 }
0x2217   :  { %v2844_v59 = vmul.f32 %v2843_v53, %v2838_v57 }
0x2218   :  { %v3629_v54 = vpop.eup %3628 }
0x2219   :  { %v2850_v60 = vadd.f32 %v2849_v56, %v2844_v59  ;;  %v2839_v61 = vmul.f32 %v3629_v54, %v2823_v40 }
0x221b   :  { %2853 = vst.msk [vmem:[#allocation11 + $0x40] sm:$0xff] %vm113_vm0, %v2850_v60  ;;  %v2845_v2 = vmul.f32 %v2843_v53, %v2839_v61  ;;  %v2859_v3 = vadd.f32 %v2857_v63, %v2850_v60 }
0x221d   :  { %v2851_v4 = vadd.f32 %v2849_v56, %v2845_v2  ;;  %v2861_v5 = vmul.f32 0.25, %v2859_v3 }
0x221f   :  { %2854 = vst.msk [vmem:[#allocation11 + $0x48] sm:$0xff] %vm113_vm0, %v2851_v4  ;;  %v2860_v62 = vadd.f32 %v2858_v23, %v2851_v4  ;;  %v2863_v55 = vpack.c.bf16 %v2861_v5, %v2861_v5 }
0x2221   :  { %v2862_v31 = vmul.f32 0.25, %v2860_v62  ;;  %v2878_v34 = vunpack.c.l.b16 %v2863_v55 }
0x2223   :  { %v2864_v10 = vpack.c.bf16 %v2862_v31, %v2862_v31 }
0x2225   :  { %v2879_v11 = vunpack.c.l.b16 %v2864_v10 }
0x2227   :  { %v2880_v8 = vrot.slane %v2879_v11, 7 }
0x2229   :  { %v2882_v14 = vsel %vm2881_vm5, %v2880_v8, %v2878_v34 }
0x222a   :  { %v2883_v9 = vpack.c.b16 %v2882_v14, %v2882_v14 }
0x222c   :  { %3465 = vmatmul.mubr.msk.bf16.vlgmr.msra.gmra.mxu1 %vm113_vm0, %v2883_v9 }
0x222d   :  { %3743 = shalt.err (!%p3740_p1)
}
0x222e   :  { %2951 = dma.vmem_to_hbm [thread:$0]  %s2946_s8, 1280, %s4458_s11, [#allocation4], %s3789_s19, %s3789_s19, %s3790_s20  }
0x222f   :  { %v3125_v35 = vld [vmem:[%s4457_s10] ss:$0 sm:$0xff]  ;;  %s3797_s4 = smov [#allocation12]  }
0x2230   :  { %s2958_s13 = sshll.u32 %s3797_s4, 4  ;;  %s2959_s13 = int_to_ptr.vmem [resolvable:$true] %s2958_s13 }
0x2231   :  { %s3752_s14 = scalar_lea.vmem %s2959_s13, 32  ;;  %p3757_p3 = scmp.lt.s32.totalorder %s2959_s13, %s2959_s13 }
0x2232   :  { %p3753_p2 = scmp.ne.s32.totalorder %s2959_s13, %s3752_s14  ;;  %p3758_p4 = scmp.lt.s32.totalorder %s3752_s14, %s3752_s14 }
0x2234   :  { %p3759_p5 = por %p3758_p4, %p3757_p3 }
0x2236   :  { %p3760_p6 = pnand %p3759_p5, %p3753_p2 }
0x22ec   :  { %v2933_v58 = vpop.f32.mrf.mxu1 }
0x22ed   :  { %v2934_v37 = vadd.f32 %v3125_v35, %v2933_v58 }
0x22ee   :  { %v3466_v15 = vpop.f32.mrf.mxu1 }
0x22ef   :  { %2939 = vst [vmem:[#allocation12] sm:$0x3] %v2934_v37 }
0x22f0   :  { %v2936_v0 = vpop.f32.mrf.mxu1 }
0x22f1   :  { %3763 = shalt.err (!%p3760_p6)
}
0x22f2   :  { %2961 = dma.vmem_to_hbm [thread:$0]  %s2959_s13, 32, %s4459_s12, [#allocation13]   ;;  %v3467_v16 = vpop.f32.mrf.mxu1 }
0x22f3   :  { %3778 = dma.done.wait [#allocation4], 1280  }
0x22f4   :  { %3779 = vsyncadd [#allocation4], 4294966016 }
0x22f5   :  { %3780 = dma.done.wait [#allocation13], 32  }
0x22f6   :  { %3781 = vsyncadd [#allocation13], 4294967264 }
0x22f7   :  { %2968 = vsyncpa [#allocation3], 1 }
0x22f8   :  { %2969 = vsyncpa [#allocation6], 1 }
0x22f9   :  { %2970 = vsyncpa [#allocation9], 1 }
0x22fa   :  { %2971 = vsyncpa [#allocation4], 1 }
0x22fb   :  { %2972 = vsyncpa [#allocation13], 1 }

</bundles_post_ra>
